<compile_context>
chip_gen: v6e
topology: v6e:2x2x1
jax: 0.10.0
libtpu: 0.0.40
codegen_flags: <defaults>
</compile_context>

<pallas_src>
import functools

import jax
import jax.numpy as jnp
import numpy as np
from jax import lax
from jax.experimental import pallas as pl
from jax.experimental.pallas import tpu as pltpu

EPS = 1e-5
EXPANSION = 4

# Constant (weight / BN-shift) operands have a grid-invariant index_map, so
# double buffering them only wastes VMEM -> single-buffer when supported.
_CONST_PIPELINE_MODE = pl.Buffered(1) if hasattr(pl, "Buffered") else None


def _const_spec(shape):
    """BlockSpec for a grid-invariant operand (weights / BN shifts)."""
    index_map = lambda *_: (0,) * len(shape)
    if _CONST_PIPELINE_MODE is not None:
        return pl.BlockSpec(shape, index_map, pipeline_mode=_CONST_PIPELINE_MODE)
    return pl.BlockSpec(shape, index_map)


# ------------------------------ Pallas kernel ------------------------------

def _shift_rows(a, k):
    """b[p] = a[p + k] along axis 0, zero fill outside [0, rows).  k static.

    One fused "select rows + zero pad" copy (slice + concat).  pltpu.roll on
    the sublane axis would offload the move to the XLU, but cross-tile sublane
    rotates are less uniformly supported across TPU generations, so the proven
    form is kept; the taps are consumed immediately by the im2col slab below,
    so live ranges stay bounded.
    """
    if k == 0:
        return a
    m = a.shape[0]
    z = jnp.zeros((abs(k), a.shape[1]), a.dtype)
    if k > 0:
        return jnp.concatenate([a[k:, :], z], axis=0)
    return jnp.concatenate([z, a[: m + k, :]], axis=0)


def _bottleneck_kernel(*refs, H, W, stride, has_shortcut):
    if has_shortcut:
        (x_ref, w1_ref, b1_ref, w2_ref, b2_ref,
         w3_ref, b3_ref, ws_ref, bs_ref, o_ref) = refs
    else:
        (x_ref, w1_ref, b1_ref, w2_ref, b2_ref,
         w3_ref, b3_ref, o_ref) = refs
        ws_ref = bs_ref = None

    s = stride
    Ho, Wo = H // s, W // s
    Mo = Ho * Wo                      # rows of the strided output feature map
    C1 = w1_ref.shape[1]

    # x rows are phase-major: row k*Mo + ho*Wo + wo holds input pixel
    # (s*ho + py, s*wo + px) with k = py*s + px (identity ordering for s=1).
    x = x_ref[0]                                            # (H*W, Cin) bf16

    # ---- conv1 (1x1, BN scale folded into weights) + shift + ReLU ----------
    y1 = jnp.dot(x, w1_ref[...], preferred_element_type=jnp.float32)
    # Cast to bf16 once; all tap shifts / masks below run on bf16.
    y1 = jnp.maximum(y1 + b1_ref[...], 0.0).astype(jnp.bfloat16)   # (H*W, C1)

    # ---- conv2: 3x3, pad=1, stride s ----------------------------------------
    # Gather the 9 taps directly at the strided output resolution (Mo rows --
    # no full-resolution conv + downsample), stack them along K into one
    # (Mo, 9*C1) im2col slab, and do a single MXU matmul with the (9*C1, C1)
    # stacked weights (K = 9*C1 fills the 256-wide MXU far better than nine
    # K = C1 matmuls, and removes the zero-init accumulator + 8 f32 adds).
    col = lax.broadcasted_iota(jnp.int32, (Mo, 1), 0) % Wo
    not_left = col >= 1                # output column wo-1 exists
    not_right = col <= Wo - 2          # output column wo+1 exists

    taps = []
    for dy in range(3):
        py = (dy - 1) % s              # source phase (row parity)
        dh = (dy - 1 - py) // s        # shift (in output rows) inside the phase
        for dx in range(3):
            px = (dx - 1) % s
            dw = (dx - 1 - px) // s
            k = py * s + px
            phase = y1[k * Mo:(k + 1) * Mo, :]            # static slice
            tap = _shift_rows(phase, dh * Wo + dw)        # zero-filled shift
            if dw < 0:
                tap = jnp.where(not_left, tap, jnp.zeros_like(tap))
            elif dw > 0:
                tap = jnp.where(not_right, tap, jnp.zeros_like(tap))
            taps.append(tap)
    slab = jnp.concatenate(taps, axis=1)                  # (Mo, 9*C1) bf16
    y2 = jnp.dot(slab, w2_ref[...], preferred_element_type=jnp.float32)
    y2 = jnp.maximum(y2 + b2_ref[...], 0.0).astype(jnp.bfloat16)   # (Mo, C1)

    # ---- conv3 (1x1) + BN shift, shortcut, residual add, final ReLU --------
    out = jnp.dot(y2, w3_ref[...], preferred_element_type=jnp.float32) + b3_ref[...]
    xs = x[0:Mo, :]                    # input rows at (s*ho, s*wo): phase (0,0)
    if has_shortcut:
        out = out + jnp.dot(xs, ws_ref[...],
                            preferred_element_type=jnp.float32) + bs_ref[...]
    else:
        # TODO(synk): identity shortcut adds the bf16-cast input; feed an f32
        #             copy of x if tighter accumulation precision is required.
        out = out + xs.astype(jnp.float32)
    o_ref[0] = jnp.maximum(out, 0.0).astype(o_ref.dtype)


# ------------------------------ JAX wrapper --------------------------------

def bn_fold(gamma, beta, mean, var):
    scale = gamma / jnp.sqrt(var + EPS)
    shift = beta - mean * scale
    return scale, shift


def bottleneck_forward(x_nchw, params, stride, out_dtype=jnp.bfloat16):
    """Fused Pallas implementation of BottleNeck.forward.  x_nchw: (N,Cin,H,W)."""
    N, Cin, H, W = x_nchw.shape
    C1 = params["w1"].shape[0]
    Cexp = params["w3"].shape[0]
    has_shortcut = (stride != 1) or (Cin != Cexp)
    if stride > 1:
        assert H % stride == 0 and W % stride == 0, "odd H/W with stride>1 unsupported"
    Ho, Wo = H // stride, W // stride
    M, Mo = H * W, Ho * Wo

    # NCHW -> phase-major (N, H*W, Cin) bf16 (channels on lanes).  Row
    # k*Mo + ho*Wo + wo holds pixel (stride*ho + py, stride*wo + px) with
    # k = py*stride + px; for stride 1 this is the plain row-major flattening.
    # This one cheap XLA reshape/transpose makes the in-kernel strided 3x3
    # taps plain static slices + shifts.
    x_nhwc = jnp.transpose(x_nchw, (0, 2, 3, 1))
    if stride == 1:
        x_flat = x_nhwc.reshape(N, M, Cin)
    else:
        x_flat = (x_nhwc.reshape(N, Ho, stride, Wo, stride, Cin)
                  .transpose(0, 2, 4, 1, 3, 5)
                  .reshape(N, M, Cin))
    x_flat = x_flat.astype(jnp.bfloat16)

    # Fold BN scale into conv weight columns (inference BN); shifts stay f32.
    s1, sh1 = bn_fold(params["g1"], params["b1"], params["m1"], params["v1"])
    w1m = (jnp.transpose(params["w1"][:, :, 0, 0], (1, 0)) * s1[None, :]).astype(jnp.bfloat16)
    s2, sh2 = bn_fold(params["g2"], params["b2"], params["m2"], params["v2"])
    w2m = ((jnp.transpose(params["w2"], (2, 3, 1, 0)).reshape(9, C1, C1)
            * s2[None, None, :]).astype(jnp.bfloat16).reshape(9 * C1, C1))
    s3, sh3 = bn_fold(params["g3"], params["b3"], params["m3"], params["v3"])
    w3m = (jnp.transpose(params["w3"][:, :, 0, 0], (1, 0)) * s3[None, :]).astype(jnp.bfloat16)

    in_specs = [
        pl.BlockSpec((1, M, Cin), lambda i: (i, 0, 0)),
        _const_spec((Cin, C1)),
        _const_spec((1, C1)),
        _const_spec((9 * C1, C1)),
        _const_spec((1, C1)),
        _const_spec((C1, Cexp)),
        _const_spec((1, Cexp)),
    ]
    args = [x_flat, w1m,
            sh1.reshape(1, C1).astype(jnp.float32), w2m,
            sh2.reshape(1, C1).astype(jnp.float32), w3m,
            sh3.reshape(1, Cexp).astype(jnp.float32)]
    if has_shortcut:
        ss, shs = bn_fold(params["gs"], params["bs"], params["ms"], params["vs"])
        wsm = (jnp.transpose(params["ws"][:, :, 0, 0], (1, 0)) * ss[None, :]).astype(jnp.bfloat16)
        in_specs += [_const_spec((Cin, Cexp)), _const_spec((1, Cexp))]
        args += [wsm, shs.reshape(1, Cexp).astype(jnp.float32)]

    kern = functools.partial(_bottleneck_kernel, H=H, W=W, stride=stride,
                             has_shortcut=has_shortcut)
    out = pl.pallas_call(
        kern,
        out_shape=jax.ShapeDtypeStruct((N, Mo, Cexp), out_dtype),   # bf16 writeback
        grid=(N,),
        in_specs=in_specs,
        out_specs=pl.BlockSpec((1, Mo, Cexp), lambda i: (i, 0, 0)),
        compiler_params=pltpu.CompilerParams(
            dimension_semantics=("parallel",),
            # Raise the scoped-VMEM limit above the 16/32 MiB defaults while
            # staying under v7x's 64 MiB physical VMEM.
            vmem_limit_bytes=48 * 1024 * 1024,
        ),
    )(*args)

    out = out.reshape(N, Ho, Wo, Cexp)
    return jnp.transpose(out, (0, 3, 1, 2))               # back to NCHW


# --------------------------- pure-JAX reference -----------------------------

def bottleneck_reference(x, params, stride):
    def conv(x, w, s, pad):
        return lax.conv_general_dilated(
            x, w, (s, s), pad, dimension_numbers=("NCHW", "OIHW", "NCHW"))

    def bn(x, g, b, m, v):
        inv = 1.0 / jnp.sqrt(v + EPS)
        return (x - m[None, :, None, None]) * inv[None, :, None, None] \
            * g[None, :, None, None] + b[None, :, None, None]

    y = conv(x, params["w1"], 1, "VALID")
    y = jax.nn.relu(bn(y, params["g1"], params["b1"], params["m1"], params["v1"]))
    y = conv(y, params["w2"], stride, ((1, 1), (1, 1)))
    y = jax.nn.relu(bn(y, params["g2"], params["b2"], params["m2"], params["v2"]))
    y = conv(y, params["w3"], 1, "VALID")
    y = bn(y, params["g3"], params["b3"], params["m3"], params["v3"])

    Cexp = params["w3"].shape[0]
    if stride != 1 or x.shape[1] != Cexp:
        sc = conv(x, params["ws"], stride, "VALID")
        sc = bn(sc, params["gs"], params["bs"], params["ms"], params["vs"])
    else:
        sc = x
    return jax.nn.relu(y + sc)


# --------------------------------- main --------------------------------------

def init_params(key, in_channels, out_channels):
    cexp = out_channels * EXPANSION
    keys = jax.random.split(key, 20)

    def bn_params(k0, k1, k2, k3, c):
        return (jax.random.uniform(k0, (c,), jnp.float32, 0.5, 1.5),   # gamma
                0.1 * jax.random.normal(k1, (c,), jnp.float32),        # beta
                0.1 * jax.random.normal(k2, (c,), jnp.float32),        # running_mean
                jax.random.uniform(k3, (c,), jnp.float32, 0.5, 1.5))   # running_var

    p = {}
    p["w1"] = 0.1 * jax.random.normal(keys[0], (out_channels, in_channels, 1, 1), jnp.float32)
    p["g1"], p["b1"], p["m1"], p["v1"] = bn_params(keys[1], keys[2], keys[3], keys[4], out_channels)
    p["w2"] = 0.1 * jax.random.normal(keys[5], (out_channels, out_channels, 3, 3), jnp.float32)
    p["g2"], p["b2"], p["m2"], p["v2"] = bn_params(keys[6], keys[7], keys[8], keys[9], out_channels)
    p["w3"] = 0.1 * jax.random.normal(keys[10], (cexp, out_channels, 1, 1), jnp.float32)
    p["g3"], p["b3"], p["m3"], p["v3"] = bn_params(keys[11], keys[12], keys[13], keys[14], cexp)
    p["ws"] = 0.1 * jax.random.normal(keys[15], (cexp, in_channels, 1, 1), jnp.float32)
    p["gs"], p["bs"], p["ms"], p["vs"] = bn_params(keys[16], keys[17], keys[18], keys[19], cexp)
    return p


if __name__ == "__main__":
    key = jax.random.PRNGKey(0)

    # (N, Cin, H, W, out_channels, stride)
    configs = [
        (2, 16, 16, 16, 8, 1),    # projection shortcut (channel change), stride 1
        (2, 16, 16, 16, 8, 2),    # projection shortcut, stride 2
        (2, 32, 16, 16, 8, 1),    # identity shortcut (Cin == out_channels * 4)
        (2, 64, 16, 16, 32, 2),   # lane-dense output channels (Cexp = 128), stride 2
    ]

    for idx, (N, Cin, H, W, oc, stride) in enumerate(configs):
        k_x, k_p = jax.random.split(jax.random.fold_in(key, idx))
        x = jax.random.normal(k_x, (N, Cin, H, W), jnp.float32)
        params = init_params(k_p, Cin, oc)

        out = jax.jit(functools.partial(bottleneck_forward, stride=stride))(x, params)
        out = jax.block_until_ready(out)
        ref = jax.block_until_ready(bottleneck_reference(x, params, stride))

        Ho, Wo = H // stride, W // stride
        assert out.shape == (N, oc * EXPANSION, Ho, Wo), out.shape
        # bf16 matmul inputs and bf16 output (f32 accumulation) vs. f32 reference.
        np.testing.assert_allclose(np.asarray(out).astype(np.float32),
                                   np.asarray(ref), rtol=5e-2, atol=5e-2)

    print("KERNEL_OK")
</pallas_src>

<mosaic_0001>
module attributes {stable_mosaic.version = 11 : i64} {
  func.func @_bottleneck_kernel(%arg0: i32, %arg1: memref<1x256x16xbf16, #tpu.memory_space<vmem>>, %arg2: memref<16x8xbf16, #tpu.memory_space<vmem>>, %arg3: memref<1x8xf32, #tpu.memory_space<vmem>>, %arg4: memref<72x8xbf16, #tpu.memory_space<vmem>>, %arg5: memref<1x8xf32, #tpu.memory_space<vmem>>, %arg6: memref<8x32xbf16, #tpu.memory_space<vmem>>, %arg7: memref<1x32xf32, #tpu.memory_space<vmem>>, %arg8: memref<16x32xbf16, #tpu.memory_space<vmem>>, %arg9: memref<1x32xf32, #tpu.memory_space<vmem>>, %arg10: memref<1x256x32xbf16, #tpu.memory_space<vmem>>) attributes {dimension_semantics = [#tpu.dimension_semantics<parallel>], iteration_bounds = array<i64: 2>, scalar_prefetch = 0 : i64, scratch_operands = 0 : i64, tpu.core_type = #tpu.core_type<tc>, window_params = [{transform_indices = @transform_0, window_bounds = array<i64: 1, 256, 16>}, {pipeline_mode = #tpu.pipeline_mode<synchronous>, transform_indices = @transform_1, window_bounds = array<i64: 16, 8>}, {pipeline_mode = #tpu.pipeline_mode<synchronous>, transform_indices = @transform_2, window_bounds = array<i64: 1, 8>}, {pipeline_mode = #tpu.pipeline_mode<synchronous>, transform_indices = @transform_3, window_bounds = array<i64: 72, 8>}, {pipeline_mode = #tpu.pipeline_mode<synchronous>, transform_indices = @transform_4, window_bounds = array<i64: 1, 8>}, {pipeline_mode = #tpu.pipeline_mode<synchronous>, transform_indices = @transform_5, window_bounds = array<i64: 8, 32>}, {pipeline_mode = #tpu.pipeline_mode<synchronous>, transform_indices = @transform_6, window_bounds = array<i64: 1, 32>}, {pipeline_mode = #tpu.pipeline_mode<synchronous>, transform_indices = @transform_7, window_bounds = array<i64: 16, 32>}, {pipeline_mode = #tpu.pipeline_mode<synchronous>, transform_indices = @transform_8, window_bounds = array<i64: 1, 32>}, {transform_indices = @transform_9, window_bounds = array<i64: 1, 256, 32>}]} {
    %c0 = arith.constant 0 : index
    %c0_0 = arith.constant 0 : index
    %c0_1 = arith.constant 0 : index
    %0 = vector.load %arg1[%c0, %c0_0, %c0_1] : memref<1x256x16xbf16, #tpu.memory_space<vmem>>, vector<1x256x16xbf16>
    %1 = vector.shape_cast %0 : vector<1x256x16xbf16> to vector<256x16xbf16>
    %c0_2 = arith.constant 0 : index
    %c0_3 = arith.constant 0 : index
    %2 = vector.load %arg2[%c0_2, %c0_3] : memref<16x8xbf16, #tpu.memory_space<vmem>>, vector<16x8xbf16>
    %cst = arith.constant dense<0.000000e+00> : vector<256x8xf32>
    %3 = tpu.matmul %1, %2, %cst {dimension_numbers = #tpu.dot_dimension_numbers<[1], [0], [0], [1], [0, 0, 1, 1], [], []>} : vector<256x16xbf16>, vector<16x8xbf16>, vector<256x8xf32> -> vector<256x8xf32>
    %c0_4 = arith.constant 0 : index
    %c0_5 = arith.constant 0 : index
    %4 = vector.load %arg3[%c0_4, %c0_5] : memref<1x8xf32, #tpu.memory_space<vmem>>, vector<1x8xf32>
    %5 = vector.broadcast %4 : vector<1x8xf32> to vector<256x8xf32>
    %6 = arith.addf %3, %5 : vector<256x8xf32>
    %cst_6 = arith.constant 0.000000e+00 : f32
    %7 = vector.broadcast %cst_6 : f32 to vector<256x8xf32>
    %8 = arith.maximumf %6, %7 : vector<256x8xf32>
    %9 = arith.truncf %8 : vector<256x8xf32> to vector<256x8xbf16>
    %10 = tpu.iota {dimensions = array<i32: 0>} : vector<256x1xi32>
    %c16_i32 = arith.constant 16 : i32
    %c0_i32 = arith.constant 0 : i32
    %11 = arith.cmpi eq, %c16_i32, %c0_i32 : i32
    %c1_i32 = arith.constant 1 : i32
    %12 = arith.select %11, %c1_i32, %c16_i32 : i32
    %13 = vector.broadcast %12 : i32 to vector<256x1xi32>
    %14 = arith.remsi %10, %13 : vector<256x1xi32>
    %c0_i32_7 = arith.constant 0 : i32
    %15 = vector.broadcast %c0_i32_7 : i32 to vector<256x1xi32>
    %16 = arith.cmpi ne, %14, %15 : vector<256x1xi32>
    %c0_i32_8 = arith.constant 0 : i32
    %17 = vector.broadcast %c0_i32_8 : i32 to vector<256x1xi32>
    %18 = arith.cmpi slt, %14, %17 : vector<256x1xi32>
    %c0_i32_9 = arith.constant 0 : i32
    %19 = arith.cmpi slt, %12, %c0_i32_9 : i32
    %20 = vector.broadcast %19 : i1 to vector<256x1xi1>
    %21 = vector.broadcast %20 : vector<256x1xi1> to vector<256x1xi1>
    %22 = arith.xori %18, %21 : vector<256x1xi1>
    %23 = arith.andi %22, %16 : vector<256x1xi1>
    %24 = vector.broadcast %12 : i32 to vector<256x1xi32>
    %25 = arith.addi %14, %24 : vector<256x1xi32>
    %26 = arith.select %23, %25, %14 : vector<256x1xi1>, vector<256x1xi32>
    %c1_i32_10 = arith.constant 1 : i32
    %27 = vector.broadcast %c1_i32_10 : i32 to vector<256x1xi32>
    %28 = arith.cmpi sge, %26, %27 : vector<256x1xi32>
    %c14_i32 = arith.constant 14 : i32
    %29 = vector.broadcast %c14_i32 : i32 to vector<256x1xi32>
    %30 = arith.cmpi sle, %26, %29 : vector<256x1xi32>
    %cst_11 = arith.constant 0.000000e+00 : bf16
    %31 = vector.broadcast %cst_11 : bf16 to vector<17x8xbf16>
    %32 = vector.extract_strided_slice %9 {offsets = [0, 0], sizes = [239, 8], strides = [1, 1]} : vector<256x8xbf16> to vector<239x8xbf16>
    %33 = tpu.concatenate %31, %32 in 0 : vector<17x8xbf16>, vector<239x8xbf16> -> vector<256x8xbf16>
    %cst_12 = arith.constant 0.000000e+00 : bf16
    %34 = vector.broadcast %cst_12 : bf16 to vector<256x8xbf16>
    %35 = vector.shape_cast %28 : vector<256x1xi1> to vector<256x1xi1>
    %36 = vector.broadcast %35 : vector<256x1xi1> to vector<256x8xi1>
    %37 = arith.select %36, %33, %34 : vector<256x8xi1>, vector<256x8xbf16>
    %cst_13 = arith.constant 0.000000e+00 : bf16
    %38 = vector.broadcast %cst_13 : bf16 to vector<16x8xbf16>
    %39 = vector.extract_strided_slice %9 {offsets = [0, 0], sizes = [240, 8], strides = [1, 1]} : vector<256x8xbf16> to vector<240x8xbf16>
    %40 = tpu.concatenate %38, %39 in 0 : vector<16x8xbf16>, vector<240x8xbf16> -> vector<256x8xbf16>
    %cst_14 = arith.constant 0.000000e+00 : bf16
    %41 = vector.broadcast %cst_14 : bf16 to vector<15x8xbf16>
    %42 = vector.extract_strided_slice %9 {offsets = [0, 0], sizes = [241, 8], strides = [1, 1]} : vector<256x8xbf16> to vector<241x8xbf16>
    %43 = tpu.concatenate %41, %42 in 0 : vector<15x8xbf16>, vector<241x8xbf16> -> vector<256x8xbf16>
    %cst_15 = arith.constant 0.000000e+00 : bf16
    %44 = vector.broadcast %cst_15 : bf16 to vector<256x8xbf16>
    %45 = vector.shape_cast %30 : vector<256x1xi1> to vector<256x1xi1>
    %46 = vector.broadcast %45 : vector<256x1xi1> to vector<256x8xi1>
    %47 = arith.select %46, %43, %44 : vector<256x8xi1>, vector<256x8xbf16>
    %cst_16 = arith.constant 0.000000e+00 : bf16
    %48 = vector.broadcast %cst_16 : bf16 to vector<1x8xbf16>
    %49 = vector.extract_strided_slice %9 {offsets = [0, 0], sizes = [255, 8], strides = [1, 1]} : vector<256x8xbf16> to vector<255x8xbf16>
    %50 = tpu.concatenate %48, %49 in 0 : vector<1x8xbf16>, vector<255x8xbf16> -> vector<256x8xbf16>
    %cst_17 = arith.constant 0.000000e+00 : bf16
    %51 = vector.broadcast %cst_17 : bf16 to vector<256x8xbf16>
    %52 = vector.shape_cast %28 : vector<256x1xi1> to vector<256x1xi1>
    %53 = vector.broadcast %52 : vector<256x1xi1> to vector<256x8xi1>
    %54 = arith.select %53, %50, %51 : vector<256x8xi1>, vector<256x8xbf16>
    %cst_18 = arith.constant 0.000000e+00 : bf16
    %55 = vector.broadcast %cst_18 : bf16 to vector<1x8xbf16>
    %56 = vector.extract_strided_slice %9 {offsets = [1, 0], sizes = [255, 8], strides = [1, 1]} : vector<256x8xbf16> to vector<255x8xbf16>
    %57 = tpu.concatenate %56, %55 in 0 : vector<255x8xbf16>, vector<1x8xbf16> -> vector<256x8xbf16>
    %cst_19 = arith.constant 0.000000e+00 : bf16
    %58 = vector.broadcast %cst_19 : bf16 to vector<256x8xbf16>
    %59 = vector.shape_cast %30 : vector<256x1xi1> to vector<256x1xi1>
    %60 = vector.broadcast %59 : vector<256x1xi1> to vector<256x8xi1>
    %61 = arith.select %60, %57, %58 : vector<256x8xi1>, vector<256x8xbf16>
    %cst_20 = arith.constant 0.000000e+00 : bf16
    %62 = vector.broadcast %cst_20 : bf16 to vector<15x8xbf16>
    %63 = vector.extract_strided_slice %9 {offsets = [15, 0], sizes = [241, 8], strides = [1, 1]} : vector<256x8xbf16> to vector<241x8xbf16>
    %64 = tpu.concatenate %63, %62 in 0 : vector<241x8xbf16>, vector<15x8xbf16> -> vector<256x8xbf16>
    %cst_21 = arith.constant 0.000000e+00 : bf16
    %65 = vector.broadcast %cst_21 : bf16 to vector<256x8xbf16>
    %66 = vector.shape_cast %28 : vector<256x1xi1> to vector<256x1xi1>
    %67 = vector.broadcast %66 : vector<256x1xi1> to vector<256x8xi1>
    %68 = arith.select %67, %64, %65 : vector<256x8xi1>, vector<256x8xbf16>
    %cst_22 = arith.constant 0.000000e+00 : bf16
    %69 = vector.broadcast %cst_22 : bf16 to vector<16x8xbf16>
    %70 = vector.extract_strided_slice %9 {offsets = [16, 0], sizes = [240, 8], strides = [1, 1]} : vector<256x8xbf16> to vector<240x8xbf16>
    %71 = tpu.concatenate %70, %69 in 0 : vector<240x8xbf16>, vector<16x8xbf16> -> vector<256x8xbf16>
    %cst_23 = arith.constant 0.000000e+00 : bf16
    %72 = vector.broadcast %cst_23 : bf16 to vector<17x8xbf16>
    %73 = vector.extract_strided_slice %9 {offsets = [17, 0], sizes = [239, 8], strides = [1, 1]} : vector<256x8xbf16> to vector<239x8xbf16>
    %74 = tpu.concatenate %73, %72 in 0 : vector<239x8xbf16>, vector<17x8xbf16> -> vector<256x8xbf16>
    %cst_24 = arith.constant 0.000000e+00 : bf16
    %75 = vector.broadcast %cst_24 : bf16 to vector<256x8xbf16>
    %76 = vector.shape_cast %30 : vector<256x1xi1> to vector<256x1xi1>
    %77 = vector.broadcast %76 : vector<256x1xi1> to vector<256x8xi1>
    %78 = arith.select %77, %74, %75 : vector<256x8xi1>, vector<256x8xbf16>
    %79 = tpu.concatenate %37, %40, %47, %54, %9, %61, %68, %71, %78 in 1 : vector<256x8xbf16>, vector<256x8xbf16>, vector<256x8xbf16>, vector<256x8xbf16>, vector<256x8xbf16>, vector<256x8xbf16>, vector<256x8xbf16>, vector<256x8xbf16>, vector<256x8xbf16> -> vector<256x72xbf16>
    %c0_25 = arith.constant 0 : index
    %c0_26 = arith.constant 0 : index
    %80 = vector.load %arg4[%c0_25, %c0_26] : memref<72x8xbf16, #tpu.memory_space<vmem>>, vector<72x8xbf16>
    %cst_27 = arith.constant dense<0.000000e+00> : vector<256x8xf32>
    %81 = tpu.matmul %79, %80, %cst_27 {dimension_numbers = #tpu.dot_dimension_numbers<[1], [0], [0], [1], [0, 0, 1, 1], [], []>} : vector<256x72xbf16>, vector<72x8xbf16>, vector<256x8xf32> -> vector<256x8xf32>
    %c0_28 = arith.constant 0 : index
    %c0_29 = arith.constant 0 : index
    %82 = vector.load %arg5[%c0_28, %c0_29] : memref<1x8xf32, #tpu.memory_space<vmem>>, vector<1x8xf32>
    %83 = vector.broadcast %82 : vector<1x8xf32> to vector<256x8xf32>
    %84 = arith.addf %81, %83 : vector<256x8xf32>
    %cst_30 = arith.constant 0.000000e+00 : f32
    %85 = vector.broadcast %cst_30 : f32 to vector<256x8xf32>
    %86 = arith.maximumf %84, %85 : vector<256x8xf32>
    %87 = arith.truncf %86 : vector<256x8xf32> to vector<256x8xbf16>
    %c0_31 = arith.constant 0 : index
    %c0_32 = arith.constant 0 : index
    %88 = vector.load %arg6[%c0_31, %c0_32] : memref<8x32xbf16, #tpu.memory_space<vmem>>, vector<8x32xbf16>
    %cst_33 = arith.constant dense<0.000000e+00> : vector<256x32xf32>
    %89 = tpu.matmul %87, %88, %cst_33 {dimension_numbers = #tpu.dot_dimension_numbers<[1], [0], [0], [1], [0, 0, 1, 1], [], []>} : vector<256x8xbf16>, vector<8x32xbf16>, vector<256x32xf32> -> vector<256x32xf32>
    %c0_34 = arith.constant 0 : index
    %c0_35 = arith.constant 0 : index
    %90 = vector.load %arg7[%c0_34, %c0_35] : memref<1x32xf32, #tpu.memory_space<vmem>>, vector<1x32xf32>
    %91 = vector.broadcast %90 : vector<1x32xf32> to vector<256x32xf32>
    %92 = arith.addf %89, %91 : vector<256x32xf32>
    %c0_36 = arith.constant 0 : index
    %c0_37 = arith.constant 0 : index
    %93 = vector.load %arg8[%c0_36, %c0_37] : memref<16x32xbf16, #tpu.memory_space<vmem>>, vector<16x32xbf16>
    %cst_38 = arith.constant dense<0.000000e+00> : vector<256x32xf32>
    %94 = tpu.matmul %1, %93, %cst_38 {dimension_numbers = #tpu.dot_dimension_numbers<[1], [0], [0], [1], [0, 0, 1, 1], [], []>} : vector<256x16xbf16>, vector<16x32xbf16>, vector<256x32xf32> -> vector<256x32xf32>
    %95 = arith.addf %92, %94 : vector<256x32xf32>
    %c0_39 = arith.constant 0 : index
    %c0_40 = arith.constant 0 : index
    %96 = vector.load %arg9[%c0_39, %c0_40] : memref<1x32xf32, #tpu.memory_space<vmem>>, vector<1x32xf32>
    %97 = vector.broadcast %96 : vector<1x32xf32> to vector<256x32xf32>
    %98 = arith.addf %95, %97 : vector<256x32xf32>
    %cst_41 = arith.constant 0.000000e+00 : f32
    %99 = vector.broadcast %cst_41 : f32 to vector<256x32xf32>
    %100 = arith.maximumf %98, %99 : vector<256x32xf32>
    %101 = arith.truncf %100 : vector<256x32xf32> to vector<256x32xbf16>
    %c0_42 = arith.constant 0 : index
    %c0_43 = arith.constant 0 : index
    %c0_44 = arith.constant 0 : index
    %102 = vector.load %arg10[%c0_42, %c0_43, %c0_44] : memref<1x256x32xbf16, #tpu.memory_space<vmem>>, vector<1x256x32xbf16>
    %103 = vector.shape_cast %102 : vector<1x256x32xbf16> to vector<256x32xbf16>
    %104 = vector.shape_cast %101 : vector<256x32xbf16> to vector<1x256x32xbf16>
    tpu.vector_store %arg10[%c0_42, %c0_43, %c0_44], %104 {strides = array<i32>} : memref<1x256x32xbf16, #tpu.memory_space<vmem>>, vector<1x256x32xbf16>,
    return
  }
  func.func @transform_0(%arg0: i32) -> (i32, i32, i32) {
    %c0_i32 = arith.constant 0 : i32
    %c0_i32_0 = arith.constant 0 : i32
    %c0_i32_1 = arith.constant 0 : i32
    return %arg0, %c0_i32, %c0_i32_0 : i32, i32, i32
  }
  func.func @transform_1(%arg0: i32) -> (i32, i32) {
    %c0_i32 = arith.constant 0 : i32
    %c0_i32_0 = arith.constant 0 : i32
    %c0_i32_1 = arith.constant 0 : i32
    return %c0_i32, %c0_i32_0 : i32, i32
  }
  func.func @transform_2(%arg0: i32) -> (i32, i32) {
    %c0_i32 = arith.constant 0 : i32
    %c0_i32_0 = arith.constant 0 : i32
    %c0_i32_1 = arith.constant 0 : i32
    return %c0_i32, %c0_i32_0 : i32, i32
  }
  func.func @transform_3(%arg0: i32) -> (i32, i32) {
    %c0_i32 = arith.constant 0 : i32
    %c0_i32_0 = arith.constant 0 : i32
    %c0_i32_1 = arith.constant 0 : i32
    return %c0_i32, %c0_i32_0 : i32, i32
  }
  func.func @transform_4(%arg0: i32) -> (i32, i32) {
    %c0_i32 = arith.constant 0 : i32
    %c0_i32_0 = arith.constant 0 : i32
    %c0_i32_1 = arith.constant 0 : i32
    return %c0_i32, %c0_i32_0 : i32, i32
  }
  func.func @transform_5(%arg0: i32) -> (i32, i32) {
    %c0_i32 = arith.constant 0 : i32
    %c0_i32_0 = arith.constant 0 : i32
    %c0_i32_1 = arith.constant 0 : i32
    return %c0_i32, %c0_i32_0 : i32, i32
  }
  func.func @transform_6(%arg0: i32) -> (i32, i32) {
    %c0_i32 = arith.constant 0 : i32
    %c0_i32_0 = arith.constant 0 : i32
    %c0_i32_1 = arith.constant 0 : i32
    return %c0_i32, %c0_i32_0 : i32, i32
  }
  func.func @transform_7(%arg0: i32) -> (i32, i32) {
    %c0_i32 = arith.constant 0 : i32
    %c0_i32_0 = arith.constant 0 : i32
    %c0_i32_1 = arith.constant 0 : i32
    return %c0_i32, %c0_i32_0 : i32, i32
  }
  func.func @transform_8(%arg0: i32) -> (i32, i32) {
    %c0_i32 = arith.constant 0 : i32
    %c0_i32_0 = arith.constant 0 : i32
    %c0_i32_1 = arith.constant 0 : i32
    return %c0_i32, %c0_i32_0 : i32, i32
  }
  func.func @transform_9(%arg0: i32) -> (i32, i32, i32) {
    %c0_i32 = arith.constant 0 : i32
    %c0_i32_0 = arith.constant 0 : i32
    %c0_i32_1 = arith.constant 0 : i32
    return %arg0, %c0_i32, %c0_i32_0 : i32, i32, i32
  }
}

</mosaic_0001>

<bundles_post_ra>
// kernel: bottleneck_forward.1
= control target key start
LH: loop header
LB: loop body
LE: loop exit
PB: predicated region body
PF: predicated region fallthrough
CT: control target
= control target key end

     0   :  { %14 = vsyncpa [#allocation3], 0  ;;  %s6151_s0 = inlined_call_operand.vmem [shape: bf16[2,256,16], index: 0, kind: input, shape index: {}]   ;;  %s6152_s1 = inlined_call_operand.vmem [shape: bf16[16,8], index: 1, kind: input, shape index: {}]   ;;  %s6153_s2 = inlined_call_operand.vmem [shape: f32[1,8], index: 2, kind: input, shape index: {}]   ;;  %s6154_s3 = inlined_call_operand.vmem [shape: bf16[72,8], index: 3, kind: input, shape index: {}]   ;;  %s6155_s4 = inlined_call_operand.vmem [shape: f32[1,8], index: 4, kind: input, shape index: {}]   ;;  %s6156_s5 = inlined_call_operand.vmem [shape: bf16[8,32], index: 5, kind: input, shape index: {}]   ;;  %s6157_s6 = inlined_call_operand.vmem [shape: f32[1,32], index: 6, kind: input, shape index: {}]   ;;  %s6158_s7 = inlined_call_operand.vmem [shape: bf16[16,32], index: 7, kind: input, shape index: {}]   ;;  %s6159_s8 = inlined_call_operand.vmem [shape: f32[1,32], index: 8, kind: input, shape index: {}]   ;;  %s6160_s9 = inlined_call_operand.hbm [shape: bf16[2,256,32], index: 9, kind: output, shape index: {}]  }
   0x1   :  { %16 = vsyncpa [#allocation3 + $0x1], 0  ;;  %s4189_s30 = smov 0   ;;  %s4191_s10 = smov 0  }
   0x2   :  { %s4193_s11 = smov 0   ;;  %s4195_s12 = smov 0  }
   0x3 LB: > { %s4210_s13 = sadd.s32 4294967295, %s4125_s12   ;;  %s3545_s14 = sadd.s32 4294967294, %s4125_s12   ;;  %s4125_s12 = sphi %s4195_s12, %s6580_s12   ;;  %s4121_s11 = sphi %s4193_s11, %s6579_s11   ;;  %s4117_s10 = sphi %s4191_s10, %s6578_s10   ;;  %s4113_s30 = sphi %s4189_s30, %s6577_s30  }
   0x4   : > { %s4214_s15 = sadd.s32 1, %s4125_s12   ;;  %s223_s16 = sadd.s32 1, %s4121_s11 }
   0x5   : > { %s220_s17 = ssub.s32 %s4125_s12, %s4214_s15  ;;  %p233_p0 = scmp.ne.s32.totalorder %s4121_s11, %s4117_s10 }
   0x6   : > { %p221_p1 = scmp.eq.s32.totalorder %s220_s17, 0  ;;  %p234_p2 = scmp.eq.s32.totalorder %s4210_s13, 1 }
   0x7   : > { %p239_p3 = scmp.ne.s32.totalorder %s4117_s10, %s4113_s30  ;;  %p240_p4 = scmp.eq.s32.totalorder %s3545_s14, 1 }
   0x8   : > { %s4225_s18 = scalar_select %p221_p1, %s4121_s11, %s223_s16  }
   0x9   : > { %p4227_p5 = por %p234_p2, %p233_p0  ;;  %p4231_p6 = por %p240_p4, %p239_p3 }
   0xa   : > { %p3548_p7 = scmp.ge.s32.totalorder %s4125_s12, 1  ;;  %p290_p8 = scmp.lt.s32.totalorder %s4125_s12, 3 }
   0xc   : > { %p291_p9 = pnand %p3548_p7, %p290_p8 }
   0xe   : > { %294 = sbr.rel (%p291_p9) target bundleno = 1027 (0x403), region = 56 }
  0x13   : > { %v4025_v0 = vld [vmem:[%s6152_s1] sm:$0xff]   ;;  %p326_p10 = scmp.lt.s32.totalorder %s4210_s13, 1  ;;  %vm6161_vm0 = vcmask 130048   ;;  %v6180_v17 = vmov 0   ;;  %s4128_s28 = smov 8   ;;  %v719_v18 = vlaneseq  ;;  %vm4129_vm2 = vmmov 1  }
  0x14   : > { %3818 = vmatprep.subr.bf16.mxu0 %v4025_v0  ;;  %1912 = vrot.lane.b32.xlu0 %v6180_v17, %s4128_s28  ;;  %v4294_v28 = vld [vmem:[%s6153_s2] ss:$0 sm:$0xff]  ;;  %vm1403_vm3 = vmpackc.low %vm4129_vm2, %vm4129_vm2  ;;  %vm6162_vm11 = vsmask.f32 7424  ;;  %vm1603_vm12 = vcmask 1047552   ;;  %s4130_s16 = smov 56  }
  0x15   : > { %s327_s23 = scalar_select %p326_p10, %s4210_s13, 1  ;;  %3819 = vmatpush3.bf16.msra.mxu0 %v4025_v0  ;;  %v4281_v19 = vshrl.u32 %v719_v18, 7  ;;  %v4314_v37 = vsel %vm1403_vm3, 65537, %v6180_v17  ;;  %vm6169_vm13 = vsmask.f32 256  ;;  %vm4361_vm15 = vmand %vm1603_vm12, %vm6162_vm11  ;;  %v6243_v31 = vmov 0 }
  0x16   : > { %s4131_s17 = smov 32   ;;  %s4132_s21 = smov 16  }
  0x17   : > { %s3712_s24 = sshll.u32 %s327_s23, 7  ;;  %v721_v20 = vadd.s32 8, %v4281_v19  ;;  %v722_v21 = vadd.s32 16, %v4281_v19  ;;  %v756_v23 = vand.u32 15, %v4281_v19  ;;  %v724_v25 = vadd.s32 32, %v4281_v19  ;;  %s4133_s22 = smov 48  }
  0x18   : > { %s4245_s27 = scalar_lea.vmem %s6151_s0, %s3712_s24  ;;  %v723_v40 = vadd.s32 24, %v4281_v19  ;;  %v728_v55 = vadd.s32 64, %v4281_v19  ;;  %s4134_s23 = smov 24  }
  0x19   : > { %v4026_v1 = vld [vmem:[%s4245_s27] sm:$0xff]   ;;  %v4027_v2 = vld [vmem:[%s4245_s27 + $0x8] sm:$0xff]   ;;  %v4028_v3 = vld [vmem:[%s4245_s27 + $0x10] sm:$0xff]   ;;  %v763_v22 = vand.u32 15, %v721_v20  ;;  %v770_v24 = vand.u32 15, %v722_v21  ;;  %vm4296_vm4 = vcmp.ge.s32.totalorder %v756_v23, 1 }
  0x1a   : > { %3820 = vmatprep.mubr.msk.bf16.mxu0 %vm6161_vm0, %v4026_v1  ;;  %v4029_v4 = vld [vmem:[%s4245_s27 + $0x18] sm:$0xff]   ;;  %v4030_v5 = vld [vmem:[%s4245_s27 + $0x20] sm:$0xff]   ;;  %v4031_v6 = vld [vmem:[%s4245_s27 + $0x28] sm:$0xff]   ;;  %v784_v32 = vand.u32 15, %v724_v25  ;;  %v777_v54 = vand.u32 15, %v723_v40  ;;  %v6237_v23 = vmov 0 }
  0x1b   : > { %3821 = vmatmul.mubr.msk.bf16.vlgmr.msra.gmra.mxu0 %vm6161_vm0, %v4027_v2  ;;  %v4032_v7 = vld [vmem:[%s4245_s27 + $0x30] sm:$0xff]   ;;  %v4033_v8 = vld [vmem:[%s4245_s27 + $0x38] sm:$0xff]   ;;  %v4034_v9 = vld [vmem:[%s4245_s27 + $0x40] sm:$0xff]   ;;  %vm4287_vm1 = vcmp.le.s32.totalorder %v763_v22, 14  ;;  %vm4303_vm6 = vcmp.ge.s32.totalorder %v770_v24, 1  ;;  %s4135_s24 = smov 40  }
  0x1c   : > { %3824 = vmatprep.mubr.msk.bf16.mxu0 %vm6161_vm0, %v4028_v3  ;;  %v4035_v10 = vld [vmem:[%s4245_s27 + $0x48] sm:$0xff]   ;;  %v4036_v11 = vld [vmem:[%s4245_s27 + $0x50] sm:$0xff]   ;;  %v4037_v12 = vld [vmem:[%s4245_s27 + $0x58] sm:$0xff]   ;;  %vm4321_vm9 = vcmp.ge.s32.totalorder %v784_v32, 1  ;;  %vm4378_vm2 = vcmp.le.s32.totalorder %v777_v54, 14  ;;  %s4136_s25 = smov 64  }
  0x1d   : > { %v4038_v13 = vld [vmem:[%s4245_s27 + $0x60] sm:$0xff]   ;;  %v4039_v14 = vld [vmem:[%s4245_s27 + $0x68] sm:$0xff]   ;;  %v4040_v15 = vld [vmem:[%s4245_s27 + $0x70] sm:$0xff]   ;;  %s323_s26 = sand.u32 1, %s4117_s10   ;;  %s4137_s29 = smov [#allocation2]  }
  0x1e   : > { %v4041_v16 = vld [vmem:[%s4245_s27 + $0x78] sm:$0xff]   ;;  %vm1671_vm5 = vmpackc.low %vm4287_vm1, %vm4287_vm1  ;;  %vm1335_vm1 = vcmask 1040384   ;;  %s4069_s14 = sshll.u32 %s4137_s29, 4  ;;  %s4070_s14 = int_to_ptr.vmem [resolvable:$false] %s4069_s14 }
  0x1f   : > { %vm1820_vm7 = vmpackc.low %vm4296_vm4, %vm4296_vm4  ;;  %v1703_v38 = vsel %vm1671_vm5, 65537, %v6180_v17 }
  0x20   : > { %vm1402_vm8 = vmpackc.low %vm4303_vm6, %vm4303_vm6  ;;  %v3601_v46 = vcombine.low %v4314_v37, %v1703_v38  ;;  %v1822_v47 = vsel %vm1820_vm7, 65537, %v6180_v17  ;;  %v6245_v38 = vmov 0 }
  0x21   : > { %v1432_v48 = vsel %vm1402_vm8, 65537, %v6180_v17  ;;  %vm1404_vm10 = vmpackc.low %vm4321_vm9, %vm4321_vm9  ;;  %v3617_v58 = vcombine.low %v1822_v47, %v4314_v37 }
  0x22   : > { %vm4344_vm14 = vcmp.ne.s16.totalorder %v3601_v46, 0  ;;  %v3586_v62 = vcombine.low %v1432_v48, %v4314_v37  ;;  %v1434_v63 = vsel %vm1404_vm10, 65537, %v6180_v17  ;;  %vm4389_vm3 = vmand %vm1335_vm1, %vm6169_vm13  ;;  %v726_v48 = vadd.s32 48, %v4281_v19 }
  0x23   : > { %3825 = vmatmul.mubr.msk.bf16.gmra.mxu0 %vm6161_vm0, %v4029_v4  ;;  %v6238_v23 = vsel %vm4389_vm3, 4294967295, %v6237_v23  ;;  %vm4407_vm5 = vcmp.ne.s16.totalorder %v3617_v58, 0  ;;  %vm1673_vm7 = vmpackc.low %vm4378_vm2, %vm4378_vm2 }
  0x24   : > { %3828 = vmatprep.mubr.msk.bf16.mxu0 %vm6161_vm0, %v4030_v5  ;;  %v6232_v5 = vmov 0  ;;  %vm4411_vm6 = vcmp.ne.s16.totalorder %v3586_v62, 0  ;;  %v798_v62 = vand.u32 15, %v726_v48 }
  0x25   : > { %v6233_v5 = vsel %vm4361_vm15, 4294967295, %v6232_v5  ;;  %v6244_v31 = vsel %vm4411_vm6, 4294967295, %v6243_v31 }
  0x26   : > { %6234 = vst [vmem:[#allocation5_spill] sm:$0xff] %v6233_v5 }
  0x2b   : > { %3829 = vmatmul.mubr.msk.bf16.gmra.mxu0 %vm6161_vm0, %v4031_v6 }
  0x2c   : > { %3832 = vmatprep.mubr.msk.bf16.mxu0 %vm6161_vm0, %v4032_v7 }
  0x33   : > { %3833 = vmatmul.mubr.msk.bf16.gmra.mxu0 %vm6161_vm0, %v4033_v8  ;;  %v812_v8 = vand.u32 15, %v728_v55 }
  0x34   : > { %3836 = vmatprep.mubr.msk.bf16.mxu0 %vm6161_vm0, %v4034_v9 }
  0x35   : > { %vm4397_vm4 = vcmp.ge.s32.totalorder %v812_v8, 1 }
  0x36   : > { %vm1408_vm9 = vmpackc.low %vm4397_vm4, %vm4397_vm4  ;;  %vm4512_vm4 = vcmp.ge.s32.totalorder %v798_v62, 1 }
  0x37   : > { %v1438_v46 = vsel %vm1408_vm9, 65537, %v6180_v17 }
  0x38   : > { %v3589_v58 = vcombine.low %v1438_v46, %v4314_v37 }
  0x3a   : > { %vm4502_vm1 = vcmp.ne.s16.totalorder %v3589_v58, 0 }
  0x3b   : > { %3837 = vmatmul.mubr.msk.bf16.gmra.mxu0 %vm6161_vm0, %v4035_v10 }
  0x3c   : > { %3840 = vmatprep.mubr.msk.bf16.mxu0 %vm6161_vm0, %v4036_v11 }
  0x43   : > { %3841 = vmatmul.mubr.msk.bf16.gmra.mxu0 %vm6161_vm0, %v4037_v12 }
  0x44   : > { %3844 = vmatprep.mubr.msk.bf16.mxu0 %vm6161_vm0, %v4038_v13 }
  0x4b   : > { %3845 = vmatmul.mubr.msk.bf16.gmra.mxu0 %vm6161_vm0, %v4039_v14 }
  0x4c   : > { %3848 = vmatprep.mubr.msk.bf16.mxu0 %vm6161_vm0, %v4040_v15 }
  0x53   : > { %3849 = vmatmul.mubr.msk.bf16.gmra.mxu0 %vm6161_vm0, %v4041_v16  ;;  %v3587_v16 = vcombine.low %v1434_v63, %v4314_v37 }
  0x55   : > { %vm4430_vm8 = vcmp.ne.s16.totalorder %v3587_v16, 0 }
  0x56   : > { %v6246_v38 = vsel %vm4430_vm8, 4294967295, %v6245_v38 }
  0xdb   : > { %v3822_v27 = vpop.f32.mrf.mxu0 }
  0xdc   : > { %v553_v33 = vadd.f32 %v3822_v27, %v4294_v28 }
  0xdd   : > { %v544_v30 = vpop.f32.mrf.mxu0 }
  0xde   : > { %v545_v35 = vadd.f32 %v4294_v28, %v544_v30  ;;  %v673_v42 = vmax.f32 %v553_v33, 0.0 }
  0xdf   : > { %v3823_v34 = vpop.f32.mrf.mxu0 }
  0xe0   : > { %v556_v36 = vadd.f32 %v3823_v34, %v4294_v28  ;;  %v671_v49 = vmax.f32 %v545_v35, 0.0 }
  0xe1   : > { %v547_v39 = vpop.f32.mrf.mxu0 }
  0xe2   : > { %v674_v43 = vmax.f32 %v556_v36, 0.0  ;;  %v548_v44 = vadd.f32 %v4294_v28, %v547_v39 }
  0xe3   : > { %v3826_v45 = vpop.f32.mrf.mxu0 }
  0xe4   : > { %v4329_v50 = vpack.c.bf16 %v674_v43, %v673_v42  ;;  %v672_v51 = vmax.f32 %v548_v44, 0.0  ;;  %v569_v52 = vadd.f32 %v3826_v45, %v4294_v28  ;;  %v725_v42 = vadd.s32 40, %v4281_v19 }
  0xe5   : > { %v560_v53 = vpop.f32.mrf.mxu0  ;;  %v1705_v43 = vsel %vm1673_vm7, 65537, %v6180_v17 }
  0xe6   : > { %v4336_v56 = vpack.c.bf16 %v672_v51, %v671_v49  ;;  %2169 = vrot.lane.b32.xlu0 %v4329_v50, %s4130_s16  ;;  %2043 = vrot.lane.b32.xlu1 %v4329_v50, %s4131_s17  ;;  %v1209_v57 = vshrl.u32 %v4329_v50, 16  ;;  %v677_v59 = vmax.f32 %v569_v52, 0.0  ;;  %v561_v0 = vadd.f32 %v4294_v28, %v560_v53 }
  0xe7   : > { %v3827_v60 = vpop.f32.mrf.mxu0  ;;  %v1212_v7 = vshll.u32 %v4329_v50, 16  ;;  %v3602_v52 = vcombine.low %v4314_v37, %v1705_v43  ;;  %v791_v54 = vand.u32 15, %v725_v42 }
  0xe8   : > { %v572_v1 = vadd.f32 %v3827_v60, %v4294_v28  ;;  %v1205_v2 = vshll.u32 %v4336_v56, 16  ;;  %v1202_v3 = vshrl.u32 %v4336_v56, 16  ;;  %v4367_v6 = vrot.slane %v1209_v57, 7 }
  0xe9   : > { %v563_v4 = vpop.f32.mrf.mxu0  ;;  %v675_v18 = vmax.f32 %v561_v0, 0.0  ;;  %v1540_v60 = vrot.slane %v1212_v7, 1  ;;  %v727_v0 = vadd.s32 56, %v4281_v19  ;;  %vm4483_vm10 = vcmp.ne.s16.totalorder %v3602_v52, 0 }
  0xea   : > { %v678_v9 = vmax.f32 %v572_v1, 0.0  ;;  %v564_v10 = vadd.f32 %v4294_v28, %v563_v4  ;;  %1916 = vrot.lane.b32.xlu1 %v4329_v50, %s4128_s28  ;;  %1914 = vrot.lane.b32.xlu0 %v4336_v56, %s4128_s28  ;;  %v1538_v11 = vrot.slane %v1205_v2, 1  ;;  %v1204_v12 = vrot.slane %v1202_v3, 7 }
  0xeb   : > { %v4375_v13 = vpop.f32.mrf.mxu0  ;;  %v1214_v14 = vor.u32 %v1212_v7, %v4367_v6  ;;  %vm4489_vm12 = vcmp.le.s32.totalorder %v791_v54, 14  ;;  %v805_v15 = vand.u32 15, %v727_v0  ;;  %v1542_v46 = vor.u32 %v1540_v60, %v1209_v57 }
  0xec   : > { %v4383_v20 = vpack.c.bf16 %v678_v9, %v677_v59  ;;  %v676_v21 = vmax.f32 %v564_v10, 0.0  ;;  %v1605_v22 = vsel %vm4361_vm15, 0, %v1538_v11  ;;  %v1207_v26 = vor.u32 %v1205_v2, %v1204_v12  ;;  %vm1675_vm2 = vmpackc.low %vm4489_vm12, %vm4489_vm12 }
  0xed   : > { %v4393_v24 = vpop.f32.mrf.mxu0  ;;  %v1798_v25 = vsel %vm4344_vm14, %v1605_v22, 0  ;;  %v4405_v29 = vsel %vm6169_vm13, %v1204_v12, %v1214_v14  ;;  %v1539_v55 = vor.u32 %v1538_v11, %v1202_v3  ;;  %v729_v12 = vadd.s32 72, %v4281_v19 }
  0xee   : > { %2041 = vrot.lane.b32.xlu0 %v4336_v56, %s4131_s17  ;;  %1960 = vrot.lane.b32.xlu1 %v1798_v25, %s4132_s21  ;;  %v4419_v33 = vsel %vm4389_vm3, 0, %v1207_v26  ;;  %v1225_v34 = vshrl.u32 %v4383_v20, 16  ;;  %v4425_v35 = vpack.c.bf16 %v676_v21, %v675_v18  ;;  %v1865_v40 = vsel %vm4407_vm5, %v4405_v29, 0 }
  0xef   : > { %v4415_v32 = vpop.f32.mrf.mxu0  ;;  %v1829_v41 = vsel %vm4411_vm6, %v4405_v29, 0  ;;  %v1228_v51 = vshll.u32 %v4383_v20, 16  ;;  %v1828_v1 = vsel %vm4407_vm5, %v4419_v33, 0  ;;  %v1541_v7 = vsel %vm6162_vm11, %v1539_v55, %v1540_v60  ;;  %vm1406_vm5 = vmpackc.low %vm4512_vm4, %vm4512_vm4 }
  0xf0   : > { %v4451_v44 = vrot.slane %v1225_v34, 7  ;;  %v1217_v49 = vshrl.u32 %v4425_v35, 16  ;;  %v1220_v8 = vshll.u32 %v4425_v35, 16  ;;  %v1799_v16 = vsel %vm4483_vm10, %v1541_v7, 0 }
  0xf1   : > { %v4437_v39 = vpop.f32.mrf.mxu0  ;;  %v1847_v18 = vsel %vm4344_vm14, %v1541_v7, 0  ;;  %v730_v22 = vadd.s32 80, %v4281_v19  ;;  %v1707_v27 = vsel %vm1675_vm2, 65537, %v6180_v17  ;;  %v585_v42 = vadd.f32 %v4375_v13, %v4294_v28 }
  0xf2   : > { %2137 = vrot.lane.b32.xlu0 %v1865_v40, %s4133_s22  ;;  %2010 = vrot.lane.b32.xlu1 %v1829_v41, %s4134_s23  ;;  %v1230_v56 = vor.u32 %v1228_v51, %v4451_v44  ;;  %v4477_v63 = vrot.slane %v1217_v49, 7  ;;  %v4530_v26 = vrot.slane %v1220_v8, 1  ;;  %v819_v40 = vand.u32 15, %v729_v12 }
  0xf3   : > { %v4453_v45 = vpop.f32.mrf.mxu0  ;;  %v732_v41 = vadd.s32 96, %v4281_v19  ;;  %v588_v43 = vadd.f32 %v4415_v32, %v4294_v28  ;;  %vm4545_vm7 = vcmp.le.s32.totalorder %v805_v15, 14  ;;  %v826_v54 = vand.u32 15, %v730_v22 }
  0xf4   : > { %v4500_v9 = vsel %vm6169_vm13, %v4477_v63, %v1230_v56  ;;  %v1544_v50 = vsel %vm6162_vm11, %v1542_v46, %v4530_v26  ;;  %v3603_v57 = vcombine.low %v4314_v37, %v1707_v27  ;;  %v1436_v13 = vsel %vm1406_vm5, 65537, %v6180_v17  ;;  %vm1677_vm12 = vmpackc.low %vm4545_vm7, %vm4545_vm7 }
  0xf5   : > { %v4463_v53 = vpop.f32.mrf.mxu0  ;;  %vm4559_vm9 = vcmp.le.s32.totalorder %v819_v40, 14  ;;  %v734_v56 = vadd.s32 112, %v4281_v19  ;;  %v840_v58 = vand.u32 15, %v732_v41  ;;  %v681_v60 = vmax.f32 %v585_v42, 0.0 }
  0xf6   : > { %2173 = vrot.lane.b32.xlu0 %v4383_v20, %s4130_s16  ;;  %2047 = vrot.lane.b32.xlu1 %v4383_v20, %s4131_s17  ;;  %v577_v62 = vadd.f32 %v4294_v28, %v4393_v24  ;;  %v682_v0 = vmax.f32 %v588_v43, 0.0  ;;  %v1881_v4 = vsel %vm4344_vm14, %v1544_v50, 0  ;;  %vm4575_vm2 = vcmp.ge.s32.totalorder %v826_v54, 1  ;;  %vm1679_vm14 = vmpackc.low %vm4559_vm9, %vm4559_vm9 }
  0xf7   : > { %v4473_v59 = vpop.f32.mrf.mxu0  ;;  %v736_v14 = vadd.s32 128, %v4281_v19  ;;  %vm4585_vm4 = vcmp.ne.s16.totalorder %v3603_v57, 0  ;;  %v3588_v61 = vcombine.low %v1436_v13, %v4314_v37  ;;  %v731_v15 = vadd.s32 88, %v4281_v19  ;;  %vm1410_vm5 = vmpackc.low %vm4575_vm2, %vm4575_vm2 }
  0xf8   : > { %v679_v22 = vmax.f32 %v577_v62, 0.0  ;;  %v4597_v27 = vpack.c.bf16 %v682_v0, %v681_v60  ;;  %vm4602_vm7 = vcmp.ge.s32.totalorder %v840_v58, 1  ;;  %v1848_v42 = vsel %vm4483_vm10, %v1544_v50, 0 }
  0xf9   : > { %v4487_v3 = vpop.f32.mrf.mxu0  ;;  %v1800_v43 = vsel %vm4585_vm4, %v1544_v50, 0  ;;  %v868_v46 = vand.u32 15, %v736_v14  ;;  %v4623_v57 = vsel %vm1679_vm14, 65537, %v6180_v17  ;;  %v1440_v13 = vsel %vm1410_vm5, 65537, %v6180_v17  ;;  %vm1412_vm0 = vmpackc.low %vm4602_vm7, %vm4602_vm7 }
  0xfa   : > { %1920 = vrot.lane.b32.xlu1 %v4383_v20, %s4128_s28  ;;  %2008 = vrot.lane.b32.xlu0 %v1828_v1, %s4134_s23  ;;  %v580_v1 = vadd.f32 %v4294_v28, %v4437_v39  ;;  %v1709_v39 = vsel %vm1677_vm12, 65537, %v6180_v17  ;;  %vm4612_vm12 = vcmp.ne.s16.totalorder %v3588_v61, 0  ;;  %v738_v60 = vadd.s32 144, %v4281_v19  ;;  %v4044_v20 = vld [vmem:[%s6154_s3 + $0x10] sm:$0xff]  }
  0xfb   : > { %v4506_v11 = vpop.f32.mrf.mxu0  ;;  %v3604_v54 = vcombine.low %v4314_v37, %v1709_v39  ;;  %v601_v32 = vadd.f32 %v4453_v45, %v4294_v28  ;;  %v604_v0 = vadd.f32 %v4473_v59, %v4294_v28  ;;  %v1831_v7 = vsel %vm4612_vm12, %v4500_v9, 0 }
  0xfc   : > { %v680_v40 = vmax.f32 %v580_v1, 0.0  ;;  %v6163_v1 = vshrl.u32 %v4597_v27, 16  ;;  %v1867_v14 = vsel %vm4430_vm8, %v4500_v9, 0  ;;  %v1222_v61 = vor.u32 %v1220_v8, %v4477_v63 }
  0xfd   : > { %v4520_v21 = vpop.f32.mrf.mxu0  ;;  %vm4654_vm9 = vcmp.ge.s32.totalorder %v868_v46, 1  ;;  %v593_v59 = vadd.f32 %v4294_v28, %v4463_v53  ;;  %v596_v39 = vadd.f32 %v4294_v28, %v4487_v3  ;;  %v1442_v53 = vsel %vm1412_vm0, 65537, %v6180_v17 }
  0xfe   : > { %1962 = vrot.lane.b32.xlu1 %v1799_v16, %s4132_s21  ;;  %2089 = vrot.lane.b32.xlu0 %v1847_v18, %s4135_s24  ;;  %v854_v18 = vand.u32 15, %v734_v56  ;;  %v833_v56 = vand.u32 15, %v731_v15  ;;  %v4636_v62 = vpack.c.bf16 %v680_v40, %v679_v22  ;;  %v1545_v15 = vor.u32 %v4530_v26, %v1217_v49  ;;  %vm1416_vm0 = vmpackc.low %vm4654_vm9, %vm4654_vm9 }
  0xff   : > { %v4533_v30 = vpop.f32.mrf.mxu0  ;;  %v4678_v63 = vrot.slane %v1228_v51, 1  ;;  %vm4680_vm5 = vcmp.ne.s16.totalorder %v3604_v54, 0  ;;  %v882_v8 = vand.u32 15, %v738_v60  ;;  %v685_v26 = vmax.f32 %v601_v32, 0.0 }
 0x100   : > { %vm4628_vm2 = vcmp.ge.s32.totalorder %v854_v18, 1  ;;  %vm4685_vm11 = vcmp.le.s32.totalorder %v833_v56, 14  ;;  %v686_v18 = vmax.f32 %v604_v0, 0.0  ;;  %v1233_v22 = vshrl.u32 %v4636_v62, 16 }
 0x101   : > { %v4549_v52 = vpop.f32.mrf.mxu0  ;;  %vm1414_vm14 = vmpackc.low %vm4628_vm2, %vm4628_vm2  ;;  %v4692_v40 = vrot.slane %v6163_v1, 7  ;;  %v4701_v41 = vsel %vm6169_vm13, %v4367_v6, %v1222_v61  ;;  %v3591_v46 = vcombine.low %v1442_v53, %v4314_v37  ;;  %v683_v54 = vmax.f32 %v593_v59, 0.0  ;;  %v4042_v59 = vld [vmem:[%s6154_s3 + $0x20] ss:$0 sps:$4 sm:$0xff]  }
 0x102   : > { %2171 = vrot.lane.b32.xlu1 %v4425_v35, %s4130_s16  ;;  %2045 = vrot.lane.b32.xlu0 %v4425_v35, %s4131_s17  ;;  %vm6275_vm7 = vsmask.f32 7424  ;;  %v1244_v56 = vshll.u32 %v4597_v27, 16  ;;  %vm1681_vm2 = vmpackc.low %vm4685_vm11, %vm4685_vm11  ;;  %v1236_v58 = vshll.u32 %v4636_v62, 16  ;;  %v3605_v60 = vcombine.low %v4314_v37, %v4623_v57 }
 0x103   : > { %v4563_v55 = vpop.f32.mrf.mxu0  ;;  %v4716_v6 = vsel %vm6275_vm7, %v1545_v15, %v4678_v63  ;;  %vm4725_vm9 = vcmp.ge.s32.totalorder %v882_v8, 1  ;;  %v1446_v0 = vsel %vm1416_vm0, 65537, %v6180_v17  ;;  %v4749_v15 = vsel %vm1681_vm2, 65537, %v6180_v17 }
 0x104   : > { %v1246_v61 = vor.u32 %v1244_v56, %v4692_v40  ;;  %v6278_v2 = vmov 0  ;;  %vm6168_vm0 = vcmask 1043456   ;;  %v1830_v47 = vsel %vm4430_vm8, %v4701_v41, 0 }
 0x105   : > { %v4579_v12 = vpop.f32.mrf.mxu0  ;;  %3972 = vmatprep.subr.msk.bf16.mxu0 %vm6168_vm0, %v4042_v59  ;;  %3973 = vmatprep.subr.msk.bf16.mxu1 %vm6168_vm0, %v4042_v59  ;;  %vm4813_vm7 = vcmp.ne.s16.totalorder %v3605_v60, 0  ;;  %vm6286_vm2 = vsmask.f32 7424  ;;  %vm6299_vm3 = vsmask.f32 7424 }
 0x106   : > { %1918 = vrot.lane.b32.xlu1 %v4425_v35, %s4128_s28  ;;  %2216 = vrot.lane.b32.xlu0 %v1881_v4, %s4136_s25  ;;  %v3590_v35 = vcombine.low %v1440_v13, %v4314_v37  ;;  %v684_v13 = vmax.f32 %v596_v39, 0.0  ;;  %v1882_v39 = vsel %vm4483_vm10, %v4716_v6, 0  ;;  %vm4765_vm10 = vcmp.ne.s16.totalorder %v3591_v46, 0  ;;  %v4043_v46 = vld [vmem:[%s6154_s3 + $0x18] sm:$0xff]  }
 0x107   : > { %v4595_v16 = vpop.f32.mrf.mxu0 }
 0x108   : > { %v4754_v8 = vpack.c.bf16 %v684_v13, %v683_v54  ;;  %vm4761_vm11 = vcmp.ne.s16.totalorder %v3590_v35, 0  ;;  %v3593_v54 = vcombine.low %v1446_v0, %v4314_v37  ;;  %v4775_v13 = vadd.f32 %v4294_v28, %v4520_v21 }
 0x109   : > { %v4625_v50 = vpop.f32.mrf.mxu0  ;;  %v6279_v2 = vsel %vm4761_vm11, 4294967295, %v6278_v2  ;;  %v1549_v35 = vrot.slane %v1236_v58, 1  ;;  %v2605_v21 = vsel %vm6168_vm0, %v4042_v59, 0 }
 0x10a   : > { %2091 = vrot.lane.b32.xlu1 %v1848_v42, %s4135_s24  ;;  %1964 = vrot.lane.b32.xlu0 %v1800_v43, %s4132_s21  ;;  %v4704_v42 = vadd.s32 104, %v4281_v19  ;;  %v4707_v43 = vsel %vm1414_vm14, 65537, %v6180_v17  ;;  %vm1418_vm14 = vmpackc.low %vm4725_vm9, %vm4725_vm9  ;;  %v6166_v32 = vshrl.u32 %v4754_v8, 16  ;;  %vm4844_vm9 = vcmp.ne.s16.totalorder %v3593_v54, 0 }
 0x10b   : > { %v4643_v4 = vpop.f32.mrf.mxu0  ;;  %v3592_v49 = vcombine.low %v4707_v43, %v4314_v37  ;;  %3853 = vmatpush3.bf16.msra.mxu0 %v2605_v21  ;;  %3967 = vmatpush3.bf16.msra.mxu1 %v2605_v21  ;;  %v4821_v21 = vadd.s32 176, %v4281_v19 }
 0x10c   : > { %3854 = vmatprep.subr.bf16.mxu0 %v4043_v46  ;;  %3963 = vmatprep.subr.bf16.mxu1 %v4043_v46 }
 0x10d   : > { %v4694_v51 = vpop.f32.mrf.mxu0 }
 0x10e   : > { %2014 = vrot.lane.b32.xlu1 %v1831_v7, %s4134_s23  ;;  %2141 = vrot.lane.b32.xlu0 %v1867_v14, %s4133_s22  ;;  %v4730_v7 = vpack.c.bf16 %v686_v18, %v685_v26  ;;  %v1235_v14 = vrot.slane %v1233_v22, 7  ;;  %v617_v26 = vadd.f32 %v4506_v11, %v4294_v28  ;;  %v6280_v18 = vmov 0 }
 0x10f   : > { %v4737_v45 = vpop.f32.mrf.mxu0  ;;  %v6281_v18 = vsel %vm4765_vm10, 4294967295, %v6280_v18  ;;  %v620_v11 = vadd.f32 %v4533_v30, %v4294_v28  ;;  %v1866_v30 = vsel %vm4411_vm6, %v4701_v41, 0  ;;  %3855 = vmatpush3.bf16.msra.mxu0 %v4043_v46  ;;  %3968 = vmatpush3.bf16.msra.mxu1 %v4043_v46  ;;  %v4866_v46 = vrot.slane %v1244_v56, 1 }
 0x110   : > { %6282 = vst [vmem:[#allocation6_spill] sm:$0xff] %v6281_v18  ;;  %v1238_v25 = vor.u32 %v1236_v58, %v1235_v14  ;;  %v6164_v57 = vshrl.u32 %v4730_v7, 16  ;;  %v612_v58 = vadd.f32 %v4294_v28, %v4549_v52  ;;  %v1548_v52 = vor.u32 %v4678_v63, %v1225_v34  ;;  %3856 = vmatprep.subr.bf16.mxu0 %v4044_v20 }
 0x111   : > { %v643_v0 = vpop.f32.mrf.mxu0  ;;  %v690_v1 = vmax.f32 %v620_v11, 0.0  ;;  %v687_v63 = vmax.f32 %v4775_v13, 0.0  ;;  %v6287_v11 = vmov 0  ;;  %v633_v34 = vadd.f32 %v4563_v55, %v4294_v28  ;;  %3964 = vmatprep.subr.bf16.mxu1 %v4044_v20 }
 0x112   : > { %2051 = vrot.lane.b32.xlu1 %v4597_v27, %s4131_s17  ;;  %2177 = vrot.lane.b32.xlu0 %v4597_v27, %s4130_s16  ;;  %v4834_v60 = vsel %vm6286_vm2, %v1548_v52, %v1549_v35  ;;  %v6288_v11 = vsel %vm4844_vm9, 4294967295, %v6287_v11  ;;  %v688_v53 = vmax.f32 %v612_v58, 0.0  ;;  %v636_v13 = vadd.f32 %v4595_v16, %v4294_v28 }
 0x113   : > { %v4818_v36 = vpop.f32.mrf.mxu0  ;;  %v6167_v52 = vshll.u32 %v4754_v8, 16  ;;  %v1251_v55 = vrot.slane %v6166_v32, 7  ;;  %v6165_v54 = vshll.u32 %v4730_v7, 16  ;;  %v693_v24 = vmax.f32 %v633_v34, 0.0  ;;  %3857 = vmatpush3.bf16.msra.mxu0 %v4044_v20  ;;  %3969 = vmatpush3.bf16.msra.mxu1 %v4044_v20 }
 0x115   : > { %v656_v16 = vpop.f32.mrf.mxu0 }
 0x116   : > { %1924 = vrot.lane.b32.xlu1 %v4597_v27, %s4128_s28  ;;  %2218 = vrot.lane.b32.xlu0 %v1882_v39, %s4136_s25  ;;  %v4783_v39 = vsel %vm6169_vm13, %v1235_v14, %v1246_v61  ;;  %v4803_v14 = vsel %vm1418_vm14, 65537, %v6180_v17  ;;  %v1801_v61 = vsel %vm4680_vm5, %v4716_v6, 0  ;;  %vm4887_vm14 = vcmp.ne.s16.totalorder %v3592_v49, 0 }
 0x117   : > { %6283 = vst [vmem:[#allocation7_spill] sm:$0xff] %v4783_v39  ;;  %v1869_v32 = vsel %vm4502_vm1, %v4783_v39, 0 }
 0x11a   : > { %2139 = vrot.lane.b32.xlu1 %v1866_v30, %s4133_s22  ;;  %2012 = vrot.lane.b32.xlu0 %v1830_v47, %s4134_s23  ;;  %v1849_v47 = vsel %vm4585_vm4, %v4716_v6, 0  ;;  %v689_v30 = vmax.f32 %v617_v26, 0.0  ;;  %v4838_v6 = vsel %vm6169_vm13, %v4451_v44, %v1238_v25  ;;  %v4842_v26 = vrot.slane %v6164_v57, 7 }
 0x11b   : > { %v625_v44 = vadd.f32 %v4294_v28, %v4579_v12  ;;  %v628_v25 = vadd.f32 %v4294_v28, %v4625_v50  ;;  %v644_v12 = vadd.f32 %v4294_v28, %v643_v0  ;;  %v4045_v50 = vld [vmem:[%s6154_s3 + $0x8] sm:$0xff]   ;;  %v740_v0 = vadd.s32 160, %v4281_v19 }
 0x11c   : > { %v4862_v58 = vpack.c.bf16 %v690_v1, %v689_v30  ;;  %v1883_v1 = vsel %vm4585_vm4, %v4834_v60, 0  ;;  %v4892_v30 = vpack.c.bf16 %v688_v53, %v687_v63  ;;  %v694_v57 = vmax.f32 %v636_v13, 0.0  ;;  %3858 = vmatprep.subr.bf16.mxu0 %v4045_v50  ;;  %3965 = vmatprep.subr.bf16.mxu1 %v4045_v50 }
 0x11d   : > { %v691_v43 = vmax.f32 %v625_v44, 0.0  ;;  %v692_v49 = vmax.f32 %v628_v25, 0.0  ;;  %v1254_v53 = vor.u32 %v6167_v52, %v1251_v55  ;;  %v896_v34 = vand.u32 15, %v740_v0  ;;  %3859 = vmatpush3.bf16.msra.mxu0 %v4045_v50  ;;  %3970 = vmatpush3.bf16.msra.mxu1 %v4045_v50 }
 0x11e   : > { %1966 = vrot.lane.b32.xlu1 %v1801_v61, %s4132_s21  ;;  %2093 = vrot.lane.b32.xlu0 %v1849_v47, %s4135_s24  ;;  %v641_v61 = vadd.f32 %v4294_v28, %v4694_v51  ;;  %v4879_v47 = vor.u32 %v1549_v35, %v1233_v22  ;;  %v1262_v51 = vor.u32 %v6165_v54, %v4842_v26  ;;  %v4903_v35 = vpop.f32.mrf.mxu0  ;;  %v696_v22 = vmax.f32 %v644_v12, 0.0  ;;  %v4046_v54 = vld [vmem:[%s6154_s3] sm:$0xff]  }
 0x11f   : > { %v649_v63 = vadd.f32 %v4643_v4, %v4294_v28  ;;  %v6170_v20 = vshrl.u32 %v4862_v58, 16  ;;  %v1850_v44 = vsel %vm4680_vm5, %v4834_v60, 0  ;;  %v652_v4 = vadd.f32 %v4737_v45, %v4294_v28  ;;  %3860 = vmatprep.subr.bf16.mxu0 %v4046_v54  ;;  %3966 = vmatprep.subr.bf16.mxu1 %v4046_v54 }
 0x120   : > { %v695_v13 = vmax.f32 %v641_v61, 0.0  ;;  %v4915_v25 = vsel %vm6169_vm13, %v1251_v55, %v1262_v51  ;;  %v910_v61 = vand.u32 15, %v4821_v21  ;;  %v1802_v12 = vsel %vm4813_vm7, %v4834_v60, 0  ;;  %v659_v55 = vpop.f32.mrf.mxu0 }
 0x121   : > { %v1833_v0 = vsel %vm4761_vm11, %v4783_v39, 0  ;;  %v4929_v52 = vpack.c.bf16 %v694_v57, %v693_v24  ;;  %v4934_v45 = vpack.c.bf16 %v692_v49, %v691_v43  ;;  %v4938_v21 = vsel %vm6169_vm13, %v4692_v40, %v1254_v53  ;;  %3861 = vmatpush3.bf16.msra.mxu0 %v4046_v54  ;;  %3971 = vmatpush3.bf16.msra.mxu1 %v4046_v54 }
 0x122   : > { %2175 = vrot.lane.b32.xlu1 %v4636_v62, %s4130_s16  ;;  %2049 = vrot.lane.b32.xlu0 %v4636_v62, %s4131_s17  ;;  %6291 = vst [vmem:[#allocation8_spill] sm:$0xff] %v4938_v21  ;;  %v6172_v60 = vshrl.u32 %v4892_v30, 16  ;;  %vm4941_vm4 = vcmp.ge.s32.totalorder %v896_v34, 1  ;;  %v697_v57 = vmax.f32 %v649_v63, 0.0  ;;  %v4945_v50 = vpack.c.bf16 %v696_v22, %v695_v13 }
 0x123   : > { %vm4954_vm2 = vcmp.ge.s32.totalorder %v910_v61, 1  ;;  %v746_v43 = vadd.s32 208, %v4281_v19  ;;  %v744_v22 = vadd.s32 192, %v4281_v19  ;;  %v6171_v49 = vshll.u32 %v4862_v58, 16  ;;  %vm1420_vm0 = vmpackc.low %vm4941_vm4, %vm4941_vm4 }
 0x124   : > { %v657_v53 = vadd.f32 %v4294_v28, %v656_v16  ;;  %v660_v34 = vadd.f32 %v4294_v28, %v659_v55  ;;  %v6176_v63 = vshrl.u32 %v4929_v52, 16  ;;  %v6179_v13 = vshll.u32 %v4892_v30, 16 }
 0x125   : > { %v6177_v16 = vshrl.u32 %v4934_v45, 16  ;;  %v938_v28 = vand.u32 15, %v746_v43  ;;  %v6175_v54 = vshrl.u32 %v4945_v50, 16  ;;  %v6195_v51 = vshll.u32 %v4934_v45, 16 }
 0x126   : > { %1922 = vrot.lane.b32.xlu1 %v4636_v62, %s4128_s28  ;;  %2220 = vrot.lane.b32.xlu0 %v1883_v1, %s4136_s25  ;;  %v4949_v62 = vrot.slane %v6170_v20, 7  ;;  %v698_v1 = vmax.f32 %v652_v4, 0.0  ;;  %v1267_v4 = vrot.slane %v6172_v60, 7  ;;  %v1450_v43 = vsel %vm1420_vm0, 65537, %v6180_v17  ;;  %vm6298_vm0 = vmpackc.low %vm4954_vm2, %vm4954_vm2 }
 0x127   : > { %vm4987_vm13 = vcmp.ge.s32.totalorder %v938_v28, 1  ;;  %v699_v20 = vmax.f32 %v657_v53, 0.0  ;;  %v1291_v60 = vrot.slane %v6176_v63, 7  ;;  %v6194_v53 = vshll.u32 %v4945_v50, 16 }
 0x128   : > { %v1278_v61 = vor.u32 %v6171_v49, %v4949_v62  ;;  %v4983_v55 = vpack.c.bf16 %v698_v1, %v697_v57  ;;  %v700_v49 = vmax.f32 %v660_v34, 0.0  ;;  %v1283_v57 = vrot.slane %v6177_v16, 7 }
 0x129   : > { %v6178_v1 = vshll.u32 %v4929_v52, 16  ;;  %v3595_v34 = vcombine.low %v1450_v43, %v4314_v37  ;;  %v750_v28 = vadd.s32 240, %v4281_v19  ;;  %v3606_v24 = vcombine.low %v4314_v37, %v4749_v15 }
 0x12a   : > { %2095 = vrot.lane.b32.xlu1 %v1850_v44, %s4135_s24  ;;  %1968 = vrot.lane.b32.xlu0 %v1802_v12, %s4132_s21  ;;  %v924_v44 = vand.u32 15, %v744_v22  ;;  %v1452_v22 = vsel %vm6298_vm0, 65537, %v6180_v17  ;;  %v3594_v12 = vcombine.low %v4803_v14, %v4314_v37  ;;  %v5041_v40 = vpack.c.bf16 %v700_v49, %v699_v20 }
 0x12b   : > { %v1294_v63 = vor.u32 %v6178_v1, %v1291_v60  ;;  %v1286_v16 = vor.u32 %v6195_v51, %v1283_v57  ;;  %v6188_v1 = vshrl.u32 %v4983_v55, 16  ;;  %vm5056_vm2 = vcmp.ne.s16.totalorder %v3606_v24, 0 }
 0x12c   : > { %vm1160_vm15 = vcmp.ge.s32.totalorder %v924_v44, 1  ;;  %v1553_v44 = vsel %vm6299_vm3, %v4879_v47, %v4866_v46  ;;  %v3596_v47 = vcombine.low %v1452_v22, %v4314_v37  ;;  %vm6301_vm3 = vsmask.f32 256 }
 0x12d   : > { %vm1424_vm4 = vmpackc.low %vm1160_vm15, %vm1160_vm15  ;;  %v5039_v14 = vsel %vm6301_vm3, %v1267_v4, %v1278_v61  ;;  %v1884_v20 = vsel %vm4680_vm5, %v1553_v44, 0  ;;  %vm5066_vm0 = vcmp.ne.s16.totalorder %v3594_v12, 0  ;;  %v5075_v3 = vsel %vm6301_vm3, %v1283_v57, %v1294_v63 }
 0x12e   : > { %2018 = vrot.lane.b32.xlu1 %v1833_v0, %s4134_s23  ;;  %2145 = vrot.lane.b32.xlu0 %v1869_v32, %s4133_s22  ;;  %v5011_v32 = vrot.slane %v6175_v54, 7  ;;  %v1454_v0 = vsel %vm1424_vm4, 65537, %v6180_v17  ;;  %vm6300_vm15 = vmpackc.low %vm4987_vm13, %vm4987_vm13  ;;  %v1270_v54 = vor.u32 %v6179_v13, %v1267_v4  ;;  %vm5046_vm13 = vcmp.ne.s16.totalorder %v3595_v34, 0 }
 0x12f   : > { %v1456_v43 = vsel %vm6300_vm15, 65537, %v6180_v17  ;;  %v3597_v15 = vcombine.low %v1454_v0, %v4314_v37  ;;  %v966_v17 = vand.u32 15, %v750_v28  ;;  %v6306_v4 = vand.u32 15, %v4704_v42  ;;  %vm6311_vm15 = vmmov %vm6301_vm3 }
 0x130   : > { %v3598_v0 = vcombine.low %v1456_v43, %v4314_v37  ;;  %v1302_v13 = vor.u32 %v6194_v53, %v5011_v32  ;;  %v5072_v28 = vsel %vm6311_vm15, %v4842_v26, %v1270_v54  ;;  %vm5077_vm5 = vcmp.ne.s16.totalorder %v3596_v47, 0  ;;  %vm6317_vm6 = vmmov %vm6301_vm3 }
 0x131   : > { %vm5062_vm4 = vcmp.le.s32.totalorder %v6306_v4, 14  ;;  %6312 = vst [vmem:[#allocation9_spill] sm:$0xff] %v5072_v28  ;;  %vm5081_vm8 = vcmp.ne.s16.totalorder %v3597_v15, 0  ;;  %v6315_v42 = vmov 0  ;;  %v5090_v26 = vsel %vm6317_vm6, %v4949_v62, %v1286_v16  ;;  %vm6320_vm9 = vmmov %vm6317_vm6 }
 0x132   : > { %2055 = vrot.lane.b32.xlu1 %v4730_v7, %s4131_s17  ;;  %2181 = vrot.lane.b32.xlu0 %v4730_v7, %s4130_s16  ;;  %v6316_v42 = vsel %vm5081_vm8, 4294967295, %v6315_v42  ;;  %v1307_v63 = vrot.slane %v6188_v1, 7  ;;  %vm1166_vm15 = vcmp.ge.s32.totalorder %v966_v17, 1  ;;  %vm5097_vm3 = vcmp.ne.s16.totalorder %v3598_v0, 0  ;;  %vm1683_vm6 = vmpackc.low %vm5062_vm4, %vm5062_vm4 }
 0x133   : > { %v5102_v57 = vsel %vm6320_vm9, %v1291_v60, %v1302_v13  ;;  %vm1430_vm11 = vmpackc.low %vm1166_vm15, %vm1166_vm15  ;;  %v6189_v43 = vshrl.u32 %v5041_v40, 16  ;;  %v748_v62 = vadd.s32 224, %v4281_v19  ;;  %v6321_v16 = vmov 0  }
 0x134   : > { %v1460_v47 = vsel %vm1430_vm11, 65537, %v6321_v16  ;;  %v6190_v17 = vshll.u32 %v5041_v40, 16  ;;  %v1868_v60 = vsel %vm4612_vm12, %v4838_v6, 0  ;;  %v1832_v13 = vsel %vm4502_vm1, %v4838_v6, 0 }
 0x135   : > { %v3600_v4 = vcombine.low %v1460_v47, %v4314_v37  ;;  %v5126_v15 = vrot.slane %v6189_v43, 7  ;;  %v952_v0 = vand.u32 15, %v748_v62  ;;  %v1851_v1 = vsel %vm4813_vm7, %v1553_v44, 0 }
 0x136   : > { %1928 = vrot.lane.b32.xlu1 %v4730_v7, %s4128_s28  ;;  %2222 = vrot.lane.b32.xlu0 %v1884_v20, %s4136_s25  ;;  %v6191_v20 = vshll.u32 %v4983_v55, 16  ;;  %v6325_v61 = vshrl.u32 %v4597_v27, 16  ;;  %vm6327_vm4 = vsmask.f32 256  ;;  %v1835_v59 = vsel %vm4887_vm14, %v4915_v25, 0 }
 0x137   : > { %6322 = vst [vmem:[#allocation10_spill] sm:$0xff] %v5126_v15  ;;  %vm5139_vm11 = vcmp.ne.s16.totalorder %v3600_v4, 0  ;;  %vm1164_vm9 = vcmp.ge.s32.totalorder %v952_v0, 1  ;;  %v1318_v62 = vor.u32 %v6190_v17, %v5126_v15  ;;  %v6326_v0 = vshll.u32 %v4754_v8, 16 }
 0x138   : > { %v1310_v47 = vor.u32 %v6191_v20, %v1307_v63  ;;  %vm1428_vm15 = vmpackc.low %vm1164_vm9, %vm1164_vm9  ;;  %v1554_v4 = vor.u32 %v4866_v46, %v6325_v61  ;;  %v1715_v20 = vsel %vm1683_vm6, 65537, %v6321_v16  ;;  %v6330_v46 = vmov 0 }
 0x139   : > { %v1555_v54 = vrot.slane %v6326_v0, 1  ;;  %v1458_v43 = vsel %vm1428_vm15, 65537, %v6321_v16  ;;  %v5159_v17 = vsel %vm6327_vm4, %v1307_v63, %v1318_v62  ;;  %vm6329_vm9 = vmmov %vm6327_vm4  ;;  %vm6333_vm6 = vsmask.f32 7424 }
 0x13a   : > { %2143 = vrot.lane.b32.xlu1 %v1868_v60, %s4133_s22  ;;  %2016 = vrot.lane.b32.xlu0 %v1832_v13, %s4134_s23  ;;  %v6323_v60 = vmov 0  ;;  %v1803_v13 = vsel %vm5056_vm2, %v1553_v44, 0  ;;  %6328 = vst [vmem:[#allocation11_spill] sm:$0xff] %v5159_v17  ;;  %v5164_v44 = vsel %vm6329_vm9, %v5011_v32, %v1310_v47  ;;  %v3607_v32 = vcombine.low %v4314_v37, %v1715_v20  ;;  %vm6338_vm9 = vmmov %vm6333_vm6 }
 0x13b   : > { %v6324_v60 = vsel %vm5139_vm11, 4294967295, %v6323_v60  ;;  %v1556_v63 = vsel %vm6333_vm6, %v1554_v4, %v1555_v54  ;;  %v735_v62 = vadd.s32 120, %v4281_v19  ;;  %v1871_v0 = vsel %vm4765_vm10, %v4915_v25, 0 }
 0x13c   : > { %v1885_v47 = vsel %vm4813_vm7, %v1556_v63, 0  ;;  %vm5189_vm15 = vcmp.ne.s16.totalorder %v3607_v32, 0  ;;  %v1852_v20 = vsel %vm5056_vm2, %v1556_v63, 0  ;;  %v6337_v32 = vshll.u32 %v4730_v7, 16 }
 0x13d   : > { %v1804_v61 = vsel %vm5189_vm15, %v1556_v63, 0  ;;  %v861_v4 = vand.u32 15, %v735_v62  ;;  %v737_v62 = vadd.s32 136, %v4281_v19  ;;  %vm6339_vm6 = vnez %v6279_v2 }
 0x13e   : > { %1970 = vrot.lane.b32.xlu1 %v1803_v13, %s4132_s21  ;;  %2097 = vrot.lane.b32.xlu0 %v1851_v1, %s4135_s24  ;;  %v3599_v1 = vcombine.low %v1458_v43, %v4314_v37  ;;  %v1834_v49 = vsel %vm4765_vm10, %v4938_v21, 0  ;;  %v1837_v39 = vsel %vm5066_vm0, %v5039_v14, 0  ;;  %v6351_v18 = vshll.u32 %v4862_v58, 16 }
 0x13f   : > { %vm1183_vm7 = vcmp.le.s32.totalorder %v861_v4, 14  ;;  %v6436_v22 = vshrl.u32 %v5041_v40, 16 }
 0x140   : > { %vm5170_vm8 = vcmp.ne.s16.totalorder %v3599_v1, 0  ;;  %v6336_v1 = vshrl.u32 %v4754_v8, 16  ;;  %vm1685_vm4 = vmpackc.low %vm1183_vm7, %vm1183_vm7  ;;  %v1564_v15 = vrot.slane %v6351_v18, 1 }
 0x141   : > { %v6331_v46 = vsel %vm5170_vm8, 4294967295, %v6330_v46  ;;  %v1717_v4 = vsel %vm1685_vm4, 65537, %v6321_v16  ;;  %vm6347_vm8 = vnez %v6288_v11 }
 0x142   : > { %6332 = vst [vmem:[#allocation12_spill] sm:$0xff] %v6331_v46  ;;  %2179 = vrot.lane.b32.xlu1 %v4754_v8, %s4130_s16  ;;  %2053 = vrot.lane.b32.xlu0 %v4754_v8, %s4131_s17  ;;  %v1557_v63 = vor.u32 %v1555_v54, %v6336_v1  ;;  %v875_v54 = vand.u32 15, %v737_v62 }
 0x146   : > { %1926 = vrot.lane.b32.xlu1 %v4754_v8, %s4128_s28  ;;  %2224 = vrot.lane.b32.xlu0 %v1885_v47, %s4136_s25  ;;  %v1558_v47 = vrot.slane %v6337_v32, 1 }
 0x14a   : > { %2099 = vrot.lane.b32.xlu1 %v1852_v20, %s4135_s24  ;;  %1972 = vrot.lane.b32.xlu0 %v1804_v61, %s4132_s21  ;;  %v1913_v20 = vpop.permute.xlu0 %1912  ;;  %v1559_v61 = vsel %vm6338_vm9, %v1557_v63, %v1558_v47  ;;  %v1870_v63 = vsel %vm6339_vm6, %v4938_v21, 0  ;;  %vm6352_vm6 = vsmask.f32 7424 }
 0x14b   : > { %v1886_v8 = vsel %vm5056_vm2, %v1559_v61, 0  ;;  %vm1185_vm2 = vcmp.le.s32.totalorder %v875_v54, 14  ;;  %v1853_v27 = vsel %vm5189_vm15, %v1559_v61, 0  ;;  %v6342_v54 = vshrl.u32 %v4730_v7, 16 }
 0x14c   : > { %vm1687_vm4 = vmpackc.low %vm1185_vm2, %vm1185_vm2 }
 0x14d   : > { %v1719_v43 = vsel %vm1687_vm4, 65537, %v6321_v16  ;;  %vm6206_vm4 = vcmask 64512  }
 0x14e   : > { %2022 = vrot.lane.b32.xlu1 %v1835_v59, %s4134_s23  ;;  %2149 = vrot.lane.b32.xlu0 %v1871_v0, %s4133_s22  ;;  %v3608_v59 = vcombine.low %v4314_v37, %v1717_v4 }
 0x150   : > { %vm5236_vm7 = vcmp.ne.s16.totalorder %v3608_v59, 0  ;;  %v1560_v59 = vor.u32 %v1558_v47, %v6342_v54  ;;  %v739_v54 = vadd.s32 152, %v4281_v19 }
 0x152   : > { %2059 = vrot.lane.b32.xlu1 %v4862_v58, %s4131_s17  ;;  %2185 = vrot.lane.b32.xlu0 %v4862_v58, %s4130_s16  ;;  %v889_v21 = vand.u32 15, %v739_v54 }
 0x154   : > { %vm5293_vm10 = vcmp.le.s32.totalorder %v889_v21, 14 }
 0x155   : > { %vm1689_vm11 = vmpackc.low %vm5293_vm10, %vm5293_vm10  ;;  %vm6215_vm10 = vcmask 457728  }
 0x156   : > { %1932 = vrot.lane.b32.xlu1 %v4862_v58, %s4128_s28  ;;  %2226 = vrot.lane.b32.xlu0 %v1886_v8, %s4136_s25  ;;  %v1805_v8 = vsel %vm5236_vm7, %v1559_v61, 0  ;;  %v1721_v18 = vsel %vm1689_vm11, 65537, %v6321_v16  ;;  %vm6214_vm11 = vcmask 588800  }
 0x158   : > { %v5224_v0 = vpop.permute.xlu0 %2169  ;;  %v5226_v1 = vpop.permute.xlu1 %2043 }
 0x15a   : > { %2147 = vrot.lane.b32.xlu1 %v1870_v63, %s4133_s22  ;;  %2020 = vrot.lane.b32.xlu0 %v1834_v49, %s4134_s23  ;;  %v6343_v63 = vshll.u32 %v4892_v30, 16 }
 0x15c   : > { %v5240_v62 = vpop.permute.xlu1 %1916  ;;  %v5242_v4 = vpop.permute.xlu0 %1914  ;;  %v1561_v49 = vrot.slane %v6343_v63, 1 }
 0x15e   : > { %1974 = vrot.lane.b32.xlu1 %v1805_v8, %s4132_s21  ;;  %2101 = vrot.lane.b32.xlu0 %v1853_v27, %s4135_s24  ;;  %v1562_v61 = vsel %vm6338_vm9, %v1560_v59, %v1561_v49  ;;  %v3609_v27 = vcombine.low %v4314_v37, %v1719_v43  ;;  %vm6346_vm9 = vcmask 130048  }
 0x15f   : > { %v1887_v47 = vsel %vm5189_vm15, %v1562_v61, 0  ;;  %v1854_v13 = vsel %vm5236_vm7, %v1562_v61, 0  ;;  %vm6211_vm15 = vcmask 195584  }
 0x160   : > { %v2042_v53 = vpop.permute.xlu0 %2041  ;;  %v1961_v51 = vpop.permute.xlu1 %1960  ;;  %vm5269_vm2 = vcmp.ne.s16.totalorder %v3609_v27, 0  ;;  %v2251_v27 = vsel %vm6206_vm4, 0, %v1913_v20  ;;  %vm6217_vm4 = vcmask 261120  }
 0x161   : > { %v1806_v17 = vsel %vm5269_vm2, %v1562_v61, 0  ;;  %v2298_v46 = vsel %vm6346_vm9, %v2251_v27, %v1961_v51  ;;  %v1873_v61 = vsel %vm6347_vm8, %v5039_v14, 0  ;;  %v6350_v51 = vshrl.u32 %v4892_v30, 16 }
 0x162   : > { %2183 = vrot.lane.b32.xlu1 %v4892_v30, %s4130_s16  ;;  %2057 = vrot.lane.b32.xlu0 %v4892_v30, %s4131_s17  ;;  %vm6212_vm9 = vcmask 326656  }
 0x163   : > { %v1563_v20 = vor.u32 %v1561_v49, %v6350_v51 }
 0x164   : > { %v2138_v8 = vpop.permute.xlu0 %2137  ;;  %v5261_v7 = vpop.permute.xlu1 %2010 }
 0x166   : > { %1930 = vrot.lane.b32.xlu1 %v4892_v30, %s4128_s28  ;;  %2228 = vrot.lane.b32.xlu0 %v1887_v47, %s4136_s25  ;;  %v1565_v30 = vsel %vm6352_vm6, %v1563_v20, %v1564_v15 }
 0x168   : > { %v5273_v59 = vpop.permute.xlu0 %2173  ;;  %v5275_v43 = vpop.permute.xlu1 %2047 }
 0x16a   : > { %2103 = vrot.lane.b32.xlu1 %v1854_v13, %s4135_s24  ;;  %1976 = vrot.lane.b32.xlu0 %v1806_v17, %s4132_s21 }
 0x16c   : > { %v5284_v47 = vpop.permute.xlu1 %1920  ;;  %v2009_v5 = vpop.permute.xlu0 %2008 }
 0x16d   : > { %v2331_v17 = vsel %vm6211_vm15, %v2298_v46, %v2009_v5  ;;  %vm6218_vm15 = vcmask 392192  }
 0x16e   : > { %2026 = vrot.lane.b32.xlu1 %v1837_v39, %s4134_s23  ;;  %2153 = vrot.lane.b32.xlu0 %v1873_v61, %s4133_s22  ;;  %v2364_v5 = vsel %vm6217_vm4, %v2331_v17, %v2042_v53  ;;  %v741_v39 = vadd.s32 168, %v4281_v19  ;;  %v1888_v61 = vsel %vm5236_vm7, %v1565_v30, 0  ;;  %v3610_v17 = vcombine.low %v4314_v37, %v1721_v18 }
 0x170   : > { %v1963_v13 = vpop.permute.xlu1 %1962  ;;  %v2090_v27 = vpop.permute.xlu0 %2089  ;;  %v903_v54 = vand.u32 15, %v741_v39  ;;  %vm5340_vm7 = vcmp.ne.s16.totalorder %v3610_v17, 0  ;;  %v6356_v17 = vshll.u32 %v4934_v45, 16  ;;  %v1838_v39 = vsel %vm5046_vm13, %v5090_v26, 0 }
 0x171   : > { %v2397_v21 = vsel %vm6212_vm9, %v2364_v5, %v2090_v27  ;;  %vm6213_vm9 = vcmask 523264   ;;  %v1836_v5 = vsel %vm6347_vm8, %v5072_v28, 0  ;;  %v1807_v18 = vsel %vm5340_vm7, %v1565_v30, 0 }
 0x172   : > { %2063 = vrot.lane.b32.xlu1 %v4929_v52, %s4131_s17  ;;  %2189 = vrot.lane.b32.xlu0 %v4929_v52, %s4130_s16  ;;  %v2430_v53 = vsel %vm6218_vm15, %v2397_v21, %v2138_v8  ;;  %v1872_v8 = vsel %vm4887_vm14, %v5072_v28, 0  ;;  %vm1189_vm6 = vcmp.le.s32.totalorder %v903_v54, 14 }
 0x173   : > { %v2463_v20 = vsel %vm6215_vm10, %v2430_v53, %v5224_v0  ;;  %v1855_v53 = vsel %vm5269_vm2, %v1565_v30, 0  ;;  %vm6360_vm10 = vcmask 64512  }
 0x174   : > { %v5316_v46 = vpop.permute.xlu1 %2171  ;;  %v5318_v49 = vpop.permute.xlu0 %2045 }
 0x176   : > { %1936 = vrot.lane.b32.xlu1 %v4929_v52, %s4128_s28  ;;  %2230 = vrot.lane.b32.xlu0 %v1888_v61, %s4136_s25  ;;  %v6355_v61 = vshrl.u32 %v4862_v58, 16 }
 0x178   : > { %v5327_v51 = vpop.permute.xlu1 %1918  ;;  %v2217_v27 = vpop.permute.xlu0 %2216  ;;  %v1566_v54 = vor.u32 %v1564_v15, %v6355_v61 }
 0x179   : > { %v2496_v32 = vsel %vm6213_vm9, %v2463_v20, %v2217_v27  ;;  %vm1691_vm9 = vmpackc.low %vm1189_vm6, %vm1189_vm6  ;;  %v1567_v20 = vrot.slane %v6356_v17, 1  ;;  %vm6357_vm6 = vsmask.f32 7424 }
 0x17a   : > { %2151 = vrot.lane.b32.xlu1 %v1872_v8, %s4133_s22  ;;  %2024 = vrot.lane.b32.xlu0 %v1836_v5, %s4134_s23  ;;  %v1723_v27 = vsel %vm1691_vm9, 65537, %v6321_v16  ;;  %vm6361_vm9 = vcmask 130048  }
 0x17b   : > { %3862 = vmatprep.mubr.msk.bf16.mxu0 %vm6214_vm11, %v2496_v32  ;;  %v1568_v30 = vsel %vm6357_vm6, %v1566_v54, %v1567_v20  ;;  %v3611_v5 = vcombine.low %v4314_v37, %v1723_v27  ;;  %vm6358_vm11 = vnez %v6244_v31  ;;  %v743_v54 = vadd.s32 184, %v4281_v19 }
 0x17c   : > { %v2092_v0 = vpop.permute.xlu1 %2091  ;;  %v1965_v21 = vpop.permute.xlu0 %1964  ;;  %v6359_v58 = vsel %vm6358_vm11, %v4419_v33, 0  ;;  %v1889_v17 = vsel %vm5269_vm2, %v1568_v30, 0  ;;  %v1856_v63 = vsel %vm5340_vm7, %v1568_v30, 0  ;;  %vm6365_vm2 = vnez %v6246_v38 }
 0x17d   : > { %v2254_v15 = vsel %vm6360_vm10, %v6359_v58, %v5242_v4  ;;  %vm5381_vm6 = vcmp.ne.s16.totalorder %v3611_v5, 0  ;;  %vm6364_vm10 = vcmask 195584   ;;  %v917_v58 = vand.u32 15, %v743_v54 }
 0x17e   : > { %1978 = vrot.lane.b32.xlu1 %v1807_v18, %s4132_s21  ;;  %2105 = vrot.lane.b32.xlu0 %v1855_v53, %s4135_s24  ;;  %v2300_v61 = vsel %vm6361_vm9, %v2254_v15, %v1963_v13  ;;  %v1808_v27 = vsel %vm5381_vm6, %v1568_v30, 0  ;;  %vm6367_vm11 = vcmask 64512   ;;  %vm6368_vm9 = vcmask 326656  }
 0x17f   : > { %v2333_v33 = vsel %vm6364_vm10, %v2300_v61, %v5261_v7  ;;  %v6366_v7 = vsel %vm6365_vm2, %v4405_v29, 0  ;;  %v1839_v30 = vsel %vm5077_vm5, %v5075_v3, 0  ;;  %vm6369_vm10 = vcmask 130048  }
 0x180   : > { %v5356_v32 = vpop.permute.xlu1 %2014  ;;  %v2142_v8 = vpop.permute.xlu0 %2141  ;;  %v2366_v5 = vsel %vm6217_vm4, %v2333_v33, %v5226_v1  ;;  %v2257_v15 = vsel %vm6367_vm11, %v6366_v7, %v5240_v62  ;;  %v1875_v38 = vsel %vm5046_vm13, %v5075_v3, 0  ;;  %vm5412_vm4 = vcmp.le.s32.totalorder %v917_v58, 14 }
 0x181   : > { %v2399_v61 = vsel %vm6368_vm9, %v2366_v5, %v2092_v0  ;;  %v2302_v54 = vsel %vm6369_vm10, %v2257_v15, %v1965_v21  ;;  %vm6372_vm2 = vcmask 457728   ;;  %vm6373_vm11 = vcmask 195584  }
 0x182   : > { %2187 = vrot.lane.b32.xlu1 %v4934_v45, %s4130_s16  ;;  %2061 = vrot.lane.b32.xlu0 %v4934_v45, %s4131_s17  ;;  %v6374_v0 = vshrl.u32 %v4934_v45, 16  ;;  %vm6375_vm9 = vcmask 523264   ;;  %vm6376_vm10 = vcmask 588800   ;;  %v6377_v58 = vshll.u32 %v4929_v52, 16 }
 0x184   : > { %v5370_v18 = vpop.permute.xlu1 %2051  ;;  %v5372_v53 = vpop.permute.xlu0 %2177  ;;  %v1569_v21 = vor.u32 %v1567_v20, %v6374_v0  ;;  %v1570_v7 = vrot.slane %v6377_v58, 1 }
 0x186   : > { %1934 = vrot.lane.b32.xlu1 %v4934_v45, %s4128_s28  ;;  %2232 = vrot.lane.b32.xlu0 %v1889_v17, %s4136_s25 }
 0x188   : > { %v5387_v4 = vpop.permute.xlu1 %1924  ;;  %v2219_v13 = vpop.permute.xlu0 %2218 }
 0x18a   : > { %2107 = vrot.lane.b32.xlu1 %v1856_v63, %s4135_s24  ;;  %1980 = vrot.lane.b32.xlu0 %v1808_v27, %s4132_s21 }
 0x18c   : > { %v2140_v17 = vpop.permute.xlu1 %2139  ;;  %v2013_v28 = vpop.permute.xlu0 %2012 }
 0x18d   : > { %v2432_v63 = vsel %vm6218_vm15, %v2399_v61, %v2140_v17  ;;  %v2335_v62 = vsel %vm6373_vm11, %v2302_v54, %v2013_v28  ;;  %vm6378_vm11 = vcmask 261120   ;;  %vm6379_vm15 = vcmask 326656  }
 0x18e   : > { %v2465_v1 = vsel %vm6372_vm2, %v2432_v63, %v5316_v46  ;;  %2030 = vrot.lane.b32.xlu1 %v1839_v30, %s4134_s23  ;;  %2157 = vrot.lane.b32.xlu0 %v1875_v38, %s4133_s22  ;;  %vm1693_vm2 = vmpackc.low %vm5412_vm4, %vm5412_vm4  ;;  %v2368_v28 = vsel %vm6378_vm11, %v2335_v62, %v5318_v49  ;;  %v745_v46 = vadd.s32 200, %v4281_v19  ;;  %vm6381_vm4 = vcmask 392192  }
 0x18f   : > { %v2498_v33 = vsel %vm6375_vm9, %v2465_v1, %v2219_v13  ;;  %vm6380_vm9 = vsmask.f32 7424  ;;  %v1725_v13 = vsel %vm1693_vm2, 65537, %v6321_v16  ;;  %vm6386_vm11 = vcmask 588800  }
 0x190   : > { %v1967_v27 = vpop.permute.xlu1 %1966  ;;  %v2094_v5 = vpop.permute.xlu0 %2093  ;;  %3863 = vmatmul.mubr.msk.bf16.vlgmr.msra.gmra.mxu0 %vm6376_vm10, %v2498_v33  ;;  %v1571_v20 = vsel %vm6380_vm9, %v1569_v21, %v1570_v7  ;;  %v931_v30 = vand.u32 15, %v745_v46  ;;  %v3612_v54 = vcombine.low %v4314_v37, %v1725_v13 }
 0x191   : > { %v2401_v45 = vsel %vm6379_vm15, %v2368_v28, %v2094_v5  ;;  %v1890_v17 = vsel %vm5340_vm7, %v1571_v20, 0  ;;  %vm6382_vm15 = vcmask 457728   ;;  %vm6383_vm7 = vcmask 523264  }
 0x192   : > { %2067 = vrot.lane.b32.xlu1 %v4983_v55, %s4131_s17  ;;  %2193 = vrot.lane.b32.xlu0 %v4983_v55, %s4130_s16  ;;  %v2434_v49 = vsel %vm6381_vm4, %v2401_v45, %v2142_v8  ;;  %v1874_v8 = vsel %vm5066_vm0, %v5090_v26, 0  ;;  %vm1193_vm10 = vcmp.le.s32.totalorder %v931_v30, 14  ;;  %vm5464_vm2 = vcmp.ne.s16.totalorder %v3612_v54, 0 }
 0x193   : > { %v2467_v29 = vsel %vm6382_vm15, %v2434_v49, %v5273_v59  ;;  %vm1695_vm9 = vmpackc.low %vm1193_vm10, %vm1193_vm10  ;;  %v1809_v21 = vsel %vm5464_vm2, %v1571_v20, 0  ;;  %v1857_v33 = vsel %vm5381_vm6, %v1571_v20, 0  ;;  %v6387_v5 = vshrl.u32 %v4929_v52, 16 }
 0x194   : > { %v5440_v15 = vpop.permute.xlu1 %2175  ;;  %v5442_v61 = vpop.permute.xlu0 %2049  ;;  %v6388_v28 = vshll.u32 %v4945_v50, 16  ;;  %v1727_v45 = vsel %vm1695_vm9, 65537, %v6321_v16  ;;  %vm6389_vm4 = vsmask.f32 7424  ;;  %vm6391_vm15 = vcmask 64512  }
 0x195   : > { %v1572_v58 = vor.u32 %v1570_v7, %v6387_v5  ;;  %v3613_v52 = vcombine.low %v4314_v37, %v1727_v45  ;;  %v6390_v7 = vsel %vm4612_vm12, %v4701_v41, 0  ;;  %v4048_v41 = vld [vmem:[%s6153_s2] ss:$0 sm:$0xff]  ;;  %vm6395_vm12 = vcmask 195584  }
 0x196   : > { %1940 = vrot.lane.b32.xlu1 %v4983_v55, %s4128_s28  ;;  %2234 = vrot.lane.b32.xlu0 %v1890_v17, %s4136_s25  ;;  %v1573_v46 = vrot.slane %v6388_v28, 1  ;;  %v747_v17 = vadd.s32 216, %v4281_v19  ;;  %v2260_v30 = vsel %vm6391_vm15, %v6390_v7, %v5327_v51  ;;  %v665_v51 = vadd.f32 %v4048_v41, %v4818_v36 }
 0x197   : > { %vm5505_vm10 = vcmp.ne.s16.totalorder %v3613_v52, 0  ;;  %vm6400_vm9 = vcmask 261120  }
 0x198   : > { %v5451_v63 = vpop.permute.xlu1 %1922  ;;  %v2221_v38 = vpop.permute.xlu0 %2220  ;;  %v1574_v20 = vsel %vm6389_vm4, %v1572_v58, %v1573_v46  ;;  %v701_v28 = vmax.f32 %v665_v51, 0.0  ;;  %vm6403_vm4 = vcmask 326656  }
 0x199   : > { %v2500_v1 = vsel %vm6383_vm7, %v2467_v29, %v2221_v38  ;;  %vm6392_vm7 = vcmask 130048   ;;  %v1858_v58 = vsel %vm5464_vm2, %v1574_v20, 0  ;;  %v1810_v36 = vsel %vm5505_vm10, %v1574_v20, 0 }
 0x19a   : > { %2155 = vrot.lane.b32.xlu1 %v1874_v8, %s4133_s22  ;;  %2028 = vrot.lane.b32.xlu0 %v1838_v39, %s4134_s23  ;;  %v2304_v29 = vsel %vm6392_vm7, %v2260_v30, %v1967_v27  ;;  %v1891_v8 = vsel %vm5381_vm6, %v1574_v20, 0  ;;  %v945_v39 = vand.u32 15, %v747_v17  ;;  %v668_v27 = vadd.f32 %v4048_v41, %v4903_v35  ;;  %vm6397_vm6 = vmmov %vm6391_vm15 }
 0x19b   : > { %3866 = vmatprep.mubr.msk.bf16.mxu1 %vm6386_vm11, %v2500_v1  ;;  %v2337_v31 = vsel %vm6395_vm12, %v2304_v29, %v5356_v32  ;;  %vm6404_vm12 = vcmask 392192  }
 0x19c   : > { %v2096_v59 = vpop.permute.xlu1 %2095  ;;  %v1969_v0 = vpop.permute.xlu0 %1968  ;;  %vm5527_vm11 = vcmp.le.s32.totalorder %v945_v39, 14  ;;  %v2370_v11 = vsel %vm6400_vm9, %v2337_v31, %v5275_v43  ;;  %v702_v45 = vmax.f32 %v668_v27, 0.0  ;;  %vm6407_vm9 = vcmask 195584  }
 0x19d   : > { %v2403_v17 = vsel %vm6403_vm4, %v2370_v11, %v2096_v59  ;;  %vm1697_vm15 = vmpackc.low %vm5527_vm11, %vm5527_vm11  ;;  %vm6409_vm11 = vcmask 523264   ;;  %vm6412_vm4 = vcmask 261120  }
 0x19e   : > { %1982 = vrot.lane.b32.xlu1 %v1809_v21, %s4132_s21  ;;  %2109 = vrot.lane.b32.xlu0 %v1857_v33, %s4135_s24  ;;  %v6396_v33 = vsel %vm6347_vm8, %v4915_v25, 0  ;;  %v6401_v25 = vsel %vm4502_vm1, %v4500_v9, 0  ;;  %vm6402_vm8 = vmmov %vm6397_vm6  ;;  %v1841_v9 = vsel %vm5097_vm3, %v5164_v44, 0  ;;  %vm6405_vm1 = vnez %v6316_v42 }
 0x19f   : > { %v2263_v32 = vsel %vm6402_vm8, %v6401_v25, %v5284_v47  ;;  %v1877_v10 = vsel %vm6405_vm1, %v5164_v44, 0  ;;  %v5562_v39 = vpack.c.bf16 %v702_v45, %v701_v28  ;;  %vm6410_vm8 = vcmask 588800  }
 0x1a0   : > { %v5480_v13 = vpop.permute.xlu1 %2018  ;;  %v2146_v49 = vpop.permute.xlu0 %2145  ;;  %v2306_v7 = vsel %vm6392_vm7, %v2263_v32, %v1969_v0  ;;  %v6408_v0 = vshrl.u32 %v4945_v50, 16  ;;  %vm6413_vm7 = vcmask 326656   ;;  %v751_v45 = vadd.s32 248, %v4281_v19 }
 0x1a2   : > { %2191 = vrot.lane.b32.xlu1 %v4945_v50, %s4130_s16  ;;  %2065 = vrot.lane.b32.xlu0 %v4945_v50, %s4131_s17  ;;  %v1575_v30 = vor.u32 %v1573_v46, %v6408_v0 }
 0x1a4   : > { %v5495_v54 = vpop.permute.xlu1 %2055  ;;  %v5497_v38 = vpop.permute.xlu0 %2181 }
 0x1a6   : > { %1938 = vrot.lane.b32.xlu1 %v4945_v50, %s4128_s28  ;;  %2236 = vrot.lane.b32.xlu0 %v1891_v8, %s4136_s25  ;;  %v1729_v8 = vsel %vm1697_vm15, 65537, %v6321_v16  ;;  %vm6414_vm15 = vsmask.f32 7424 }
 0x1a8   : > { %v1929_v1 = vpop.permute.xlu1 %1928  ;;  %v2223_v21 = vpop.permute.xlu0 %2222 }
 0x1a9   : > { %v5521_v5 = vsel %vm6397_vm6, %v6396_v33, %v1929_v1  ;;  %vm6406_vm6 = vcmask 457728   ;;  %v749_v1 = vadd.s32 232, %v4281_v19  ;;  %v1814_v19 = vshrl.u32 %v5562_v39, 16 }
 0x1aa   : > { %2111 = vrot.lane.b32.xlu1 %v1858_v58, %s4135_s24  ;;  %1984 = vrot.lane.b32.xlu0 %v1810_v36, %s4132_s21  ;;  %v1876_v36 = vsel %vm5077_vm5, %v5102_v57, 0 }
 0x1ab   : > { %v959_v11 = vand.u32 15, %v749_v1 }
 0x1ac   : > { %v2144_v20 = vpop.permute.xlu1 %2143  ;;  %v2017_v52 = vpop.permute.xlu0 %2016 }
 0x1ad   : > { %v2436_v43 = vsel %vm6404_vm12, %v2403_v17, %v2144_v20  ;;  %v2339_v59 = vsel %vm6407_vm9, %v2306_v7, %v2017_v52  ;;  %vm6417_vm9 = vcmask 457728   ;;  %v1840_v20 = vsel %vm6405_vm1, %v5102_v57, 0 }
 0x1ae   : > { %v2469_v47 = vsel %vm6406_vm6, %v2436_v43, %v5440_v15  ;;  %2034 = vrot.lane.b32.xlu1 %v1841_v9, %s4134_s23  ;;  %2161 = vrot.lane.b32.xlu0 %v1877_v10, %s4133_s22  ;;  %v6411_v15 = vshll.u32 %v4983_v55, 16  ;;  %v2372_v31 = vsel %vm6412_vm4, %v2339_v59, %v5442_v61  ;;  %v973_v7 = vand.u32 15, %v751_v45 }
 0x1af   : > { %v2502_v29 = vsel %vm6409_vm11, %v2469_v47, %v2223_v21  ;;  %v3614_v21 = vcombine.low %v4314_v37, %v1729_v8  ;;  %v6418_v9 = vshrl.u32 %v4983_v55, 16  ;;  %v6419_v47 = vshll.u32 %v5041_v40, 16 }
 0x1b0   : > { %v1971_v41 = vpop.permute.xlu1 %1970  ;;  %3867 = vmatmul.mubr.msk.bf16.vlgmr.msra.gmra.mxu1 %vm6410_vm8, %v2502_v29  ;;  %v2098_v51 = vpop.permute.xlu0 %2097  ;;  %v1576_v27 = vrot.slane %v6411_v15, 1  ;;  %v1816_v8 = vrot.slane %v1814_v19, 7  ;;  %v1583_v55 = vshll.u32 %v5562_v39, 16 }
 0x1b1   : > { %v2405_v50 = vsel %vm6413_vm7, %v2372_v31, %v2098_v51  ;;  %vm5589_vm6 = vcmp.ne.s16.totalorder %v3614_v21, 0  ;;  %v1579_v59 = vrot.slane %v6419_v47, 1  ;;  %vm5620_vm7 = vcmp.le.s32.totalorder %v973_v7, 14  ;;  %v6445_v51 = vld [vmem:[#allocation12_spill] sm:$0xff] }
 0x1b2   : > { %2071 = vrot.lane.b32.xlu1 %v5562_v39, %s4131_s17  ;;  %2197 = vrot.lane.b32.xlu0 %v5562_v39, %s4130_s16  ;;  %v1577_v46 = vsel %vm6414_vm15, %v1575_v30, %v1576_v27  ;;  %v2438_v61 = vsel %vm6404_vm12, %v2405_v50, %v2146_v49  ;;  %v1578_v10 = vor.u32 %v1576_v27, %v6418_v9  ;;  %vm6423_vm12 = vsmask.f32 7424  ;;  %v6440_v9 = vld [vmem:[#allocation7_spill] sm:$0xff] }
 0x1b3   : > { %v1892_v35 = vsel %vm5464_vm2, %v1577_v46, 0  ;;  %v2471_v49 = vsel %vm6417_vm9, %v2438_v61, %v5372_v53  ;;  %v1811_v17 = vsel %vm5589_vm6, %v1577_v46, 0  ;;  %vm1197_vm2 = vcmp.le.s32.totalorder %v959_v11, 14  ;;  %vm1701_vm9 = vmpackc.low %vm5620_vm7, %vm5620_vm7 }
 0x1b4   : > { %v5577_v33 = vpop.permute.xlu1 %2179  ;;  %v5579_v58 = vpop.permute.xlu0 %2053  ;;  %vm1699_vm4 = vmpackc.low %vm1197_vm2, %vm1197_vm2  ;;  %v1859_v43 = vsel %vm5505_vm10, %v1577_v46, 0  ;;  %vm6422_vm15 = vnez %v6238_v23  ;;  %v1580_v27 = vsel %vm6423_vm12, %v1578_v10, %v1579_v59  ;;  %vm6426_vm2 = vcmask 64512  }
 0x1b5   : > { %v1731_v0 = vsel %vm1699_vm4, 65537, %v6321_v16  ;;  %v1864_v15 = vsel %vm6422_vm15, %v1816_v8, 0  ;;  %v1817_v21 = vor.u32 %v1816_v8, %v1583_v55  ;;  %vm6428_vm4 = vnez %v6324_v60 }
 0x1b6   : > { %2159 = vrot.lane.b32.xlu1 %v1876_v36, %s4133_s22  ;;  %2238 = vrot.lane.b32.xlu0 %v1892_v35, %s4136_s25  ;;  %v3615_v31 = vcombine.low %v4314_v37, %v1731_v0  ;;  %v1880_v61 = vsel %vm6428_vm4, %v1864_v15, 0  ;;  %v1893_v36 = vsel %vm5505_vm10, %v1580_v27, 0  ;;  %vm6431_vm15 = vcmask 195584   ;;  %vm6433_vm10 = vmmov %vm6426_vm2  ;;  %v6451_v15 = vld [vmem:[#allocation5_spill] sm:$0xff] }
 0x1b7   : > { %v1860_v48 = vsel %vm5589_vm6, %v1580_v27, 0  ;;  %vm6435_vm12 = vsmask.f32 256  ;;  %v1581_v7 = vor.u32 %v1579_v59, %v6436_v22  ;;  %v4047_v22 = vld [vmem:[%s6158_s7] sm:$0xff]  }
 0x1b8   : > { %v5593_v32 = vpop.permute.xlu1 %1926  ;;  %v2225_v28 = vpop.permute.xlu0 %2224  ;;  %vm5653_vm7 = vcmp.ne.s16.totalorder %v3615_v31, 0  ;;  %3928 = vmatprep.subr.bf16.mxu1 %v4047_v22 }
 0x1b9   : > { %v2504_v62 = vsel %vm6409_vm11, %v2471_v49, %v2225_v28  ;;  %vm6424_vm11 = vnez %v6279_v2  ;;  %v6432_v49 = vsel %vm5046_vm13, %v5039_v14, 0  ;;  %v1812_v45 = vsel %vm5653_vm7, %v1580_v27, 0  ;;  %3929 = vmatpush3.bf16.msra.mxu1 %v4047_v22 }
 0x1ba   : > { %1986 = vrot.lane.b32.xlu1 %v1811_v17, %s4132_s21  ;;  %2032 = vrot.lane.b32.xlu0 %v1840_v20, %s4134_s23  ;;  %v6425_v1 = vsel %vm6424_vm11, %v4838_v6, 0  ;;  %v1585_v6 = vrot.slane %v1583_v55, 1  ;;  %vm6437_vm13 = vcmask 261120   ;;  %vm6442_vm11 = vmmov %vm6426_vm2 }
 0x1bb   : > { %3870 = vmatprep.mubr.msk.bf16.mxu1 %vm6410_vm8, %v2504_v62  ;;  %v2266_v50 = vsel %vm6426_vm2, %v6425_v1, %v5451_v63  ;;  %vm6427_vm8 = vcmask 130048   ;;  %v1733_v63 = vsel %vm1701_vm9, 65537, %v6321_v16  ;;  %v6434_v62 = vld [vmem:[#allocation10_spill] sm:$0xff]  ;;  %vm6443_vm2 = vcmask 326656   ;;  %v6455_v1 = vld [vmem:[#allocation8_spill] sm:$0xff] }
 0x1bc   : > { %v2100_v53 = vpop.permute.xlu1 %2099  ;;  %v1973_v52 = vpop.permute.xlu0 %1972  ;;  %v2308_v23 = vsel %vm6427_vm8, %v2266_v50, %v1971_v41  ;;  %v1818_v17 = vsel %vm6435_vm12, %v6434_v62, %v1817_v21  ;;  %v1844_v20 = vor.u32 %v1814_v19, %v1585_v6  ;;  %v6456_v50 = vsel %vm4887_vm14, %v6455_v1, 0 }
 0x1bd   : > { %v2341_v41 = vsel %vm6431_vm15, %v2308_v23, %v5480_v13  ;;  %v3616_v13 = vcombine.low %v4314_v37, %v1733_v63  ;;  %v1843_v19 = vsel %vm6428_vm4, %v1818_v17, 0  ;;  %vm6444_vm15 = vcmask 392192  }
 0x1be   : > { %2195 = vrot.lane.b32.xlu1 %v5041_v40, %s4130_s16  ;;  %2113 = vrot.lane.b32.xlu0 %v1859_v43, %s4135_s24  ;;  %v2374_v14 = vsel %vm6437_vm13, %v2341_v41, %v5370_v18  ;;  %v6438_v43 = vld [vmem:[#allocation6_spill] sm:$0xff]  ;;  %vm6449_vm13 = vcmask 457728   ;;  %vm6460_vm4 = vcmask 261120   ;;  %vm6462_vm14 = vcmask 326656  }
 0x1bf   : > { %vm6439_vm9 = vnez %v6438_v43  ;;  %v2407_v37 = vsel %vm6443_vm2, %v2374_v14, %v2100_v53  ;;  %vm5693_vm12 = vcmp.ne.s16.totalorder %v3616_v13, 0  ;;  %vm6453_vm2 = vsmask.f32 7424 }
 0x1c0   : > { %v2023_v30 = vpop.permute.xlu1 %2022  ;;  %v5618_v29 = vpop.permute.xlu0 %2149  ;;  %v6441_v10 = vsel %vm6439_vm9, %v6440_v9, 0  ;;  %vm6450_vm9 = vcmask 195584   ;;  %v1586_v27 = vsel %vm6453_vm2, %v1581_v7, %v1585_v6  ;;  %vm6463_vm2 = vmmov %vm6460_vm4 }
 0x1c1   : > { %v2269_v47 = vsel %vm6442_vm11, %v6441_v10, %v5387_v4  ;;  %vm6452_vm11 = vnez %v6451_v15  ;;  %v1894_v63 = vsel %vm5589_vm6, %v1586_v27, 0  ;;  %vm6466_vm6 = vcmask 457728  }
 0x1c2   : > { %1942 = vrot.lane.b32.xlu1 %v5041_v40, %s4128_s28  ;;  %2069 = vrot.lane.b32.xlu0 %v5041_v40, %s4131_s17  ;;  %v2310_v40 = vsel %vm6427_vm8, %v2269_v47, %v1973_v52  ;;  %v1846_v52 = vsel %vm6452_vm11, %v1844_v20, 0  ;;  %vm6454_vm8 = vcmask 523264   ;;  %vm6461_vm11 = vcmask 195584   ;;  %s3549_s28 = sshll.u32 %s323_s26, 7 }
 0x1c3   : > { %v1862_v6 = vsel %vm5693_vm12, %v1846_v52, 0  ;;  %v1895_v7 = vsel %vm5653_vm7, %v1846_v52, 0  ;;  %s5975_s17 = scalar_lea.vmem [#allocation2], %s3549_s28  ;;  %s4071_s28 = scalar_lea.vmem %s4070_s14, 4096 }
 0x1c4   : > { %v5642_v46 = vpop.permute.xlu1 %2059  ;;  %v5644_v39 = vpop.permute.xlu0 %2185 }
 0x1c6   : > { %2167 = vrot.lane.b32.xlu1 %v1880_v61, %s4133_s22  ;;  %2240 = vrot.lane.b32.xlu0 %v1893_v36, %s4136_s25 }
 0x1c8   : > { %v1933_v35 = vpop.permute.xlu1 %1932  ;;  %v2227_v11 = vpop.permute.xlu0 %2226 }
 0x1c9   : > { %v5667_v28 = vsel %vm6433_vm10, %v6432_v49, %v1933_v35  ;;  %vm6446_vm10 = vnez %v6445_v51 }
 0x1ca   : > { %2115 = vrot.lane.b32.xlu1 %v1860_v48, %s4135_s24  ;;  %1988 = vrot.lane.b32.xlu0 %v1812_v45, %s4132_s21  ;;  %v1879_v18 = vsel %vm6446_vm10, %v1818_v17, 0  ;;  %v6465_v48 = vld [vmem:[#allocation11_spill] sm:$0xff]  ;;  %v1861_v17 = vsel %vm5653_vm7, %v1586_v27, 0  ;;  %vm6471_vm7 = vcmask 64512  }
 0x1cb   : > { %v1878_v25 = vsel %vm5097_vm3, %v6465_v48, 0 }
 0x1cc   : > { %v2148_v0 = vpop.permute.xlu1 %2147  ;;  %v2021_v8 = vpop.permute.xlu0 %2020 }
 0x1cd   : > { %v2440_v59 = vsel %vm6444_vm15, %v2407_v37, %v2148_v0  ;;  %v2343_v53 = vsel %vm6450_vm9, %v2310_v40, %v2021_v8  ;;  %vm6457_vm15 = vcmask 64512   ;;  %vm6459_vm9 = vcmask 130048  }
 0x1ce   : > { %v2473_v4 = vsel %vm6449_vm13, %v2440_v59, %v5577_v33  ;;  %2038 = vrot.lane.b32.xlu1 %v1843_v19, %s4134_s23  ;;  %2165 = vrot.lane.b32.xlu0 %v1879_v18, %s4133_s22  ;;  %v2272_v33 = vsel %vm6457_vm15, %v6456_v50, %v5593_v32  ;;  %vm6458_vm13 = vcmask 588800   ;;  %v2376_v36 = vsel %vm6460_vm4, %v2343_v53, %v5579_v58 }
 0x1cf   : > { %v2506_v31 = vsel %vm6454_vm8, %v2473_v4, %v2227_v11  ;;  %vm6464_vm4 = vcmask 392192   ;;  %vm6467_vm15 = vmmov %vm6458_vm13  ;;  %v6470_v0 = vsel %vm6405_vm1, %v5075_v3, 0  ;;  %v6478_v3 = vld [vmem:[#allocation9_spill] sm:$0xff] }
 0x1d0   : > { %v1975_v23 = vpop.permute.xlu1 %1974  ;;  %3871 = vmatmul.mubr.msk.bf16.gmra.mxu1 %vm6458_vm13, %v2506_v31  ;;  %v2102_v21 = vpop.permute.xlu0 %2101  ;;  %v6479_v53 = vsel %vm5066_vm0, %v6478_v3, 0  ;;  %vm6480_vm1 = vmmov %vm6471_vm7 }
 0x1d1   : > { %v2312_v61 = vsel %vm6459_vm9, %v2272_v33, %v1975_v23  ;;  %v2409_v41 = vsel %vm6462_vm14, %v2376_v36, %v2102_v21  ;;  %vm6472_vm9 = vmmov %vm6462_vm14 }
 0x1d2   : > { %v2345_v56 = vsel %vm6461_vm11, %v2312_v61, %v2023_v30  ;;  %2119 = vrot.lane.b32.xlu1 %v1862_v6, %s4135_s24  ;;  %2242 = vrot.lane.b32.xlu0 %v1894_v63, %s4136_s25  ;;  %v2442_v58 = vsel %vm6464_vm4, %v2409_v41, %v5618_v29  ;;  %v1842_v30 = vsel %vm6446_vm10, %v6465_v48, 0  ;;  %v1813_v29 = vsel %vm5693_vm12, %v1586_v27, 0  ;;  %vm6474_vm14 = vmmov %vm6464_vm4 }
 0x1d3   : > { %v2378_v32 = vsel %vm6463_vm2, %v2345_v56, %v5495_v54  ;;  %v2475_v54 = vsel %vm6466_vm6, %v2442_v58, %v5497_v38  ;;  %v2816_v38 = vld [vmem:[%s6156_s5] sm:$0xf]  ;;  %vm6468_vm12 = vcmask 1043456   ;;  %vm6473_vm11 = vcmask 130048   ;;  %vm6475_vm2 = vmmov %vm6466_vm6 }
 0x1d4   : > { %v2184_v35 = vpop.permute.xlu1 %2183  ;;  %v2058_v11 = vpop.permute.xlu0 %2057  ;;  %3974 = vmatprep.subr.msk.bf16.mxu0 %vm6468_vm12, %v2816_v38  ;;  %vm6469_vm13 = vmmov %vm6468_vm12  ;;  %vm6476_vm4 = vcmask 195584   ;;  %vm6483_vm12 = vcmask 261120  }
 0x1d5   : > { %v2873_v14 = vsel %vm6469_vm13, %v2816_v38, 0  ;;  %vm6477_vm6 = vmmov %vm6454_vm8 }
 0x1d6   : > { %2163 = vrot.lane.b32.xlu1 %v1878_v25, %s4133_s22  ;;  %2036 = vrot.lane.b32.xlu0 %v1842_v30, %s4134_s23  ;;  %vm6484_vm13 = vmmov %vm6476_vm4  ;;  %v6491_v30 = vsel %vm6446_vm10, %v5164_v44, 0  ;;  %v6499_v44 = vsel %vm5077_vm5, %v5090_v26, 0  ;;  %s3745_s22 = sshll.u32 %s4210_s13, 11  ;;  %s3483_s23 = sshll.u32 %s5975_s17, 4  ;;  %s6103_s23 = int_to_ptr.vmem [resolvable:$true] %s3483_s23 }
 0x1d7   : > { %3895 = vmatpush3.bf16.msra.mxu0 %v2873_v14  ;;  %vm6487_vm0 = vmmov %vm6474_vm14  ;;  %s6109_s13 = scalar_lea.sflag [#allocation3], %s323_s26  ;;  %p4072_p0 = scmp.lt.s32.totalorder %s6103_s23, %s4070_s14 }
 0x1d8   : > { %v1931_v49 = vpop.permute.xlu1 %1930  ;;  %v2229_v45 = vpop.permute.xlu0 %2228 }
 0x1d9   : > { %v2508_v62 = vsel %vm6454_vm8, %v2475_v54, %v2229_v45  ;;  %v2278_v15 = vsel %vm6480_vm1, %v6479_v53, %v1931_v49  ;;  %vm6481_vm8 = vmmov %vm6467_vm15 }
 0x1da   : > { %1990 = vrot.lane.b32.xlu1 %v1813_v29, %s4132_s21  ;;  %2117 = vrot.lane.b32.xlu0 %v1861_v17, %s4135_s24  ;;  %s4065_s24 = scalar_lea.vmem %s6103_s23, 2048 }
 0x1db   : > { %3874 = vmatprep.mubr.msk.bf16.mxu1 %vm6467_vm15, %v2508_v62  ;;  %vm6482_vm15 = vmmov %vm6473_vm11  ;;  %p4066_p11 = scmp.ne.s32.totalorder %s6103_s23, %s4065_s24  ;;  %p4073_p1 = scmp.lt.s32.totalorder %s4071_s28, %s4065_s24 }
 0x1dc   : > { %v2104_v13 = vpop.permute.xlu1 %2103  ;;  %v1977_v20 = vpop.permute.xlu0 %1976 }
 0x1dd   : > { %v2411_v19 = vsel %vm6472_vm9, %v2378_v32, %v2104_v13  ;;  %v2314_v18 = vsel %vm6473_vm11, %v5521_v5, %v1977_v20  ;;  %vm6488_vm11 = vmmov %vm6475_vm2  ;;  %p4067_p12 = pnand %p4066_p11, %p4227_p5  ;;  %p4074_p2 = por %p4073_p1, %p4072_p0 }
 0x1de   : > { %2199 = vrot.lane.b32.xlu1 %v6321_v16, %s4130_s16  ;;  %2244 = vrot.lane.b32.xlu0 %v1895_v7, %s4136_s25 }
 0x1df   : > { %p4068_p13 = pneg %p4067_p12 }
 0x1e0   : > { %v2027_v43 = vpop.permute.xlu1 %2026  ;;  %v2154_v9 = vpop.permute.xlu0 %2153 }
 0x1e1   : > { %p4075_p3 = pnand %p4074_p2, %p4068_p13 }
 0x1e2   : > { %2246 = vrot.lane.b32.xlu1 %v6321_v16, %s4136_s25 }
 0x1e4   : > { %v2064_v10 = vpop.permute.xlu1 %2063  ;;  %v2190_v2 = vpop.permute.xlu0 %2189 }
 0x1e8   : > { %v1937_v47 = vpop.permute.xlu1 %1936  ;;  %v2231_v37 = vpop.permute.xlu0 %2230 }
 0x1e9   : > { %v5766_v8 = vsel %vm6471_vm7, %v6470_v0, %v1937_v47  ;;  %vm6485_vm7 = vmmov %vm6472_vm9 }
 0x1ea   : > { %vm6486_vm9 = vmmov %vm6483_vm12 }
 0x1ec   : > { %v2152_v40 = vpop.permute.xlu1 %2151  ;;  %v2025_v59 = vpop.permute.xlu0 %2024 }
 0x1ed   : > { %v2444_v16 = vsel %vm6474_vm14, %v2411_v19, %v2152_v40  ;;  %v2347_v4 = vsel %vm6476_vm4, %v2314_v18, %v2025_v59  ;;  %vm6489_vm14 = vmmov %vm6477_vm6 }
 0x1ee   : > { %v2477_v55 = vsel %vm6475_vm2, %v2444_v16, %v2184_v35  ;;  %v2380_v31 = vsel %vm6483_vm12, %v2347_v4, %v2058_v11  ;;  %vm6490_vm2 = vmmov %vm6481_vm8 }
 0x1ef   : > { %v2510_v42 = vsel %vm6477_vm6, %v2477_v55, %v2231_v37  ;;  %vm6492_vm4 = vmmov %vm6480_vm1 }
 0x1f0   : > { %v1979_v52 = vpop.permute.xlu1 %1978  ;;  %3875 = vmatmul.mubr.msk.bf16.gmra.mxu1 %vm6481_vm8, %v2510_v42  ;;  %v2106_v27 = vpop.permute.xlu0 %2105  ;;  %vm6493_vm6 = vmmov %vm6485_vm7 }
 0x1f1   : > { %v2316_v5 = vsel %vm6482_vm15, %v2278_v15, %v1979_v52  ;;  %v2413_v50 = vsel %vm6485_vm7, %v2380_v31, %v2106_v27  ;;  %vm6494_vm1 = vmmov %vm6482_vm15  ;;  %v6515_v27 = vsel %vm5097_vm3, %v5102_v57, 0 }
 0x1f2   : > { %v2349_v1 = vsel %vm6484_vm13, %v2316_v5, %v2027_v43  ;;  %v2446_v21 = vsel %vm6487_vm0, %v2413_v50, %v2154_v9  ;;  %vm6495_vm8 = vmmov %vm6487_vm0  ;;  %vm6503_vm0 = vcmask 261120  }
 0x1f3   : > { %v2382_v33 = vsel %vm6486_vm9, %v2349_v1, %v5642_v46  ;;  %v2479_v36 = vsel %vm6488_vm11, %v2446_v21, %v5644_v39  ;;  %vm6496_vm15 = vmmov %vm6488_vm11 }
 0x1f4   : > { %v2188_v34 = vpop.permute.xlu1 %2187  ;;  %v2062_v23 = vpop.permute.xlu0 %2061  ;;  %vm6497_vm12 = vmmov %vm6484_vm13 }
 0x1f5   : > { %vm6498_vm13 = vmmov %vm6489_vm14 }
 0x1f6   : > { %vm6500_vm10 = vmmov %vm6492_vm4 }
 0x1f7   : > { %vm6501_vm7 = vmmov %vm6490_vm2 }
 0x1f8   : > { %v1935_v61 = vpop.permute.xlu1 %1934  ;;  %v2233_v6 = vpop.permute.xlu0 %2232  ;;  %vm6502_vm9 = vmmov %vm6494_vm1 }
 0x1f9   : > { %v2512_v63 = vsel %vm6489_vm14, %v2479_v36, %v2233_v6  ;;  %v2284_v20 = vsel %vm6500_vm10, %v6499_v44, %v1935_v61  ;;  %vm6504_vm11 = vmmov %vm6497_vm12 }
 0x1fa   : > { %3878 = vmatprep.mubr.msk.bf16.mxu1 %vm6490_vm2, %v2512_v63  ;;  %vm6505_vm14 = vmmov %vm6493_vm6 }
 0x1fb   : > { %vm6506_vm2 = vmmov %vm6503_vm0 }
 0x1fc   : > { %v2108_v56 = vpop.permute.xlu1 %2107  ;;  %v1981_v41 = vpop.permute.xlu0 %1980  ;;  %vm6508_vm5 = vmmov %vm6496_vm15 }
 0x1fd   : > { %v2415_v39 = vsel %vm6493_vm6, %v2382_v33, %v2108_v56  ;;  %v2318_v62 = vsel %vm6494_vm1, %v5667_v28, %v1981_v41  ;;  %vm6509_vm6 = vmmov %vm6498_vm13 }
 0x1fe   : > { %vm6510_vm1 = vmmov %vm6501_vm7 }
 0x1ff   : > { %vm6519_vm3 = vmmov %vm6506_vm2 }
 0x200   : > { %v2031_v32 = vpop.permute.xlu1 %2030  ;;  %v2158_v35 = vpop.permute.xlu0 %2157 }
 0x204   : > { %v2068_v11 = vpop.permute.xlu1 %2067  ;;  %v2194_v58 = vpop.permute.xlu0 %2193 }
 0x208   : > { %v1941_v46 = vpop.permute.xlu1 %1940  ;;  %v2235_v25 = vpop.permute.xlu0 %2234 }
 0x209   : > { %v5797_v49 = vsel %vm6492_vm4, %v6491_v30, %v1941_v46  ;;  %vm6507_vm4 = vmmov %vm6495_vm8 }
 0x20c   : > { %v2156_v54 = vpop.permute.xlu1 %2155  ;;  %v2029_v45 = vpop.permute.xlu0 %2028 }
 0x20d   : > { %v2448_v29 = vsel %vm6495_vm8, %v2415_v39, %v2156_v54  ;;  %v2351_v13 = vsel %vm6497_vm12, %v2318_v62, %v2029_v45  ;;  %vm6511_vm8 = vmmov %vm6505_vm14 }
 0x20e   : > { %v2481_v17 = vsel %vm6496_vm15, %v2448_v29, %v2188_v34  ;;  %v2384_v7 = vsel %vm6503_vm0, %v2351_v13, %v2062_v23  ;;  %vm6512_vm15 = vmmov %vm6507_vm4 }
 0x20f   : > { %v2514_v51 = vsel %vm6498_vm13, %v2481_v17, %v2235_v25  ;;  %vm6513_vm12 = vmmov %vm6508_vm5 }
 0x210   : > { %v1983_v38 = vpop.permute.xlu1 %1982  ;;  %3879 = vmatmul.mubr.msk.bf16.gmra.mxu1 %vm6501_vm7, %v2514_v51  ;;  %v2110_v22 = vpop.permute.xlu0 %2109  ;;  %vm6514_vm13 = vmmov %vm6509_vm6 }
 0x211   : > { %v2320_v28 = vsel %vm6502_vm9, %v2284_v20, %v1983_v38  ;;  %v2417_v43 = vsel %vm6505_vm14, %v2384_v7, %v2110_v22  ;;  %vm6516_vm7 = vmmov %vm6510_vm1 }
 0x212   : > { %v2353_v14 = vsel %vm6504_vm11, %v2320_v28, %v2031_v32  ;;  %v2450_v26 = vsel %vm6507_vm4, %v2417_v43, %v2158_v35  ;;  %vm6517_vm0 = vmmov %vm6502_vm9 }
 0x213   : > { %v2386_v9 = vsel %vm6506_vm2, %v2353_v14, %v2064_v10  ;;  %v2483_v0 = vsel %vm6508_vm5, %v2450_v26, %v2190_v2  ;;  %vm6518_vm14 = vmmov %vm6504_vm11 }
 0x214   : > { %v2192_v47 = vpop.permute.xlu1 %2191  ;;  %v2066_v24 = vpop.permute.xlu0 %2065  ;;  %vm6520_vm4 = vmmov %vm6511_vm8 }
 0x215   : > { %vm6521_vm5 = vmmov %vm6512_vm15 }
 0x218   : > { %v1939_v37 = vpop.permute.xlu1 %1938  ;;  %v2237_v19 = vpop.permute.xlu0 %2236 }
 0x219   : > { %v2516_v40 = vsel %vm6509_vm6, %v2483_v0, %v2237_v19  ;;  %v2290_v5 = vsel %vm6500_vm10, %v6515_v27, %v1939_v37  ;;  %vm6522_vm6 = vmmov %vm6513_vm12 }
 0x21a   : > { %3882 = vmatprep.mubr.msk.bf16.mxu1 %vm6510_vm1, %v2516_v40  ;;  %vm6523_vm1 = vmmov %vm6514_vm13 }
 0x21b   : > { %vm6528_vm10 = vmmov %vm6504_vm11 }
 0x21c   : > { %v2112_v59 = vpop.permute.xlu1 %2111  ;;  %v1985_v18 = vpop.permute.xlu0 %1984 }
 0x21d   : > { %v2419_v10 = vsel %vm6511_vm8, %v2386_v9, %v2112_v59  ;;  %v2322_v50 = vsel %vm6502_vm9, %v5766_v8, %v1985_v18  ;;  %vm6524_vm8 = vmmov %vm6516_vm7  ;;  %v5871_v18 = vld [vmem:[%s6155_s4] ss:$0 sm:$0xff] }
 0x21e   : > { %vm6530_vm9 = vmmov %vm6523_vm1 }
 0x220   : > { %v2035_v16 = vpop.permute.xlu1 %2034  ;;  %v2162_v55 = vpop.permute.xlu0 %2161 }
 0x224   : > { %v2072_v4 = vpop.permute.xlu1 %2071  ;;  %v2198_v42 = vpop.permute.xlu0 %2197 }
 0x228   : > { %v2160_v3 = vpop.permute.xlu1 %2159  ;;  %v2239_v53 = vpop.permute.xlu0 %2238 }
 0x229   : > { %v2452_v15 = vsel %vm6512_vm15, %v2419_v10, %v2160_v3  ;;  %vm6525_vm15 = vmmov %vm6520_vm4 }
 0x22a   : > { %v2485_v52 = vsel %vm6513_vm12, %v2452_v15, %v2192_v47  ;;  %vm6526_vm12 = vmmov %vm6517_vm0  ;;  %v4049_v15 = vld [vmem:[%s4245_s27] sm:$0xff]  }
 0x22b   : > { %v2518_v2 = vsel %vm6514_vm13, %v2485_v52, %v2239_v53  ;;  %vm6527_vm13 = vmmov %vm6521_vm5 }
 0x22c   : > { %v1987_v31 = vpop.permute.xlu1 %1986  ;;  %3883 = vmatmul.mubr.msk.bf16.gmra.mxu1 %vm6516_vm7, %v2518_v2  ;;  %v2033_v1 = vpop.permute.xlu0 %2032  ;;  %vm6529_vm7 = vmmov %vm6522_vm6 }
 0x22d   : > { %v2324_v33 = vsel %vm6517_vm0, %v2290_v5, %v1987_v31  ;;  %v2355_v23 = vsel %vm6518_vm14, %v2322_v50, %v2033_v1  ;;  %vm6531_vm0 = vnez %v6324_v60  ;;  %vm6534_vm14 = vmmov %vm6524_vm8 }
 0x22e   : > { %v2357_v34 = vsel %vm6504_vm11, %v2324_v33, %v2035_v16  ;;  %v2388_v57 = vsel %vm6519_vm3, %v2355_v23, %v2066_v24  ;;  %v6532_v20 = vsel %vm6531_vm0, %v6465_v48, 0  ;;  %vm6533_vm11 = vcmask 64512   ;;  %vm6535_vm3 = vmmov %vm6526_vm12  ;;  %v4050_v33 = vld [vmem:[%s4245_s27 + $0x8] sm:$0xff]   ;;  %v4052_v23 = vld [vmem:[%s4245_s27 + $0x18] sm:$0xff]  }
 0x22f   : > { %v2390_v21 = vsel %vm6506_vm2, %v2357_v34, %v2068_v11  ;;  %v4051_v34 = vld [vmem:[%s4245_s27 + $0x10] sm:$0xff]  }
 0x230   : > { %v2196_v12 = vpop.permute.xlu1 %2195  ;;  %v2114_v61 = vpop.permute.xlu0 %2113 }
 0x231   : > { %v2421_v36 = vsel %vm6520_vm4, %v2388_v57, %v2114_v61  ;;  %v4055_v61 = vld [vmem:[%s4245_s27 + $0x30] sm:$0xff]  }
 0x232   : > { %v2454_v56 = vsel %vm6521_vm5, %v2421_v36, %v2162_v55  ;;  %vm6536_vm5 = vmmov %vm6528_vm10 }
 0x233   : > { %v2487_v8 = vsel %vm6522_vm6, %v2454_v56, %v2194_v58  ;;  %vm6537_vm6 = vmmov %vm6527_vm13 }
 0x234   : > { %v1943_v6 = vpop.permute.xlu1 %1942  ;;  %v2070_v63 = vpop.permute.xlu0 %2069 }
 0x235   : > { %v2296_v38 = vsel %vm6533_vm11, %v6532_v20, %v1943_v6  ;;  %vm6545_vm11 = vmmov %vm6535_vm3 }
 0x238   : > { %v2168_v41 = vpop.permute.xlu1 %2167  ;;  %v2241_v32 = vpop.permute.xlu0 %2240 }
 0x239   : > { %v2520_v35 = vsel %vm6523_vm1, %v2487_v8, %v2241_v32  ;;  %vm6538_vm1 = vmmov %vm6506_vm2  ;;  %v4056_v32 = vld [vmem:[%s4245_s27 + $0x38] sm:$0xff]  }
 0x23a   : > { %3886 = vmatprep.mubr.msk.bf16.mxu1 %vm6524_vm8, %v2520_v35  ;;  %vm6539_vm8 = vmmov %vm6529_vm7 }
 0x23c   : > { %v2116_v46 = vpop.permute.xlu1 %2115  ;;  %v1989_v11 = vpop.permute.xlu0 %1988 }
 0x23d   : > { %v2423_v45 = vsel %vm6525_vm15, %v2390_v21, %v2116_v46  ;;  %v2326_v62 = vsel %vm6526_vm12, %v5797_v49, %v1989_v11  ;;  %vm6540_vm15 = vmmov %vm6520_vm4  ;;  %v4053_v21 = vld [vmem:[%s4245_s27 + $0x20] sm:$0xff]  }
 0x23e   : > { %vm6541_vm12 = vmmov %vm6537_vm6  ;;  %v4057_v46 = vld [vmem:[%s4245_s27 + $0x40] sm:$0xff]  }
 0x240   : > { %v2039_v25 = vpop.permute.xlu1 %2038  ;;  %v2166_v30 = vpop.permute.xlu0 %2165 }
 0x244   : > { %v2120_v39 = vpop.permute.xlu1 %2119  ;;  %v2243_v54 = vpop.permute.xlu0 %2242 }
 0x248   : > { %v2164_v29 = vpop.permute.xlu1 %2163  ;;  %v2037_v17 = vpop.permute.xlu0 %2036 }
 0x249   : > { %v2456_v58 = vsel %vm6527_vm13, %v2423_v45, %v2164_v29  ;;  %v2359_v13 = vsel %vm6528_vm10, %v2326_v62, %v2037_v17  ;;  %vm6542_vm13 = vmmov %vm6530_vm9  ;;  %v4058_v62 = vld [vmem:[%s4245_s27 + $0x48] sm:$0xff]   ;;  %v4059_v29 = vld [vmem:[%s4245_s27 + $0x50] sm:$0xff]  }
 0x24a   : > { %v2489_v51 = vsel %vm6529_vm7, %v2456_v58, %v2196_v12  ;;  %v2392_v49 = vsel %vm6506_vm2, %v2359_v13, %v2070_v63  ;;  %vm6543_vm10 = vmmov %vm6534_vm14  ;;  %v4054_v12 = vld [vmem:[%s4245_s27 + $0x28] sm:$0xff]   ;;  %v4060_v17 = vld [vmem:[%s4245_s27 + $0x58] sm:$0xff]  }
 0x24b   : > { %v2522_v44 = vsel %vm6530_vm9, %v2489_v51, %v2243_v54  ;;  %vm6544_vm0 = vmmov %vm6543_vm10  ;;  %v4061_v58 = vld [vmem:[%s4245_s27 + $0x60] sm:$0xff]   ;;  %v4062_v13 = vld [vmem:[%s4245_s27 + $0x68] sm:$0xff]  }
 0x24c   : > { %v1991_v22 = vpop.permute.xlu1 %1990  ;;  %3887 = vmatmul.mubr.msk.bf16.gmra.mxu1 %vm6534_vm14, %v2522_v44  ;;  %v2118_v28 = vpop.permute.xlu0 %2117  ;;  %vm6546_vm14 = vcmask 64512   ;;  %vm6547_vm2 = vmmov %vm6535_vm3  ;;  %v4063_v51 = vld [vmem:[%s4245_s27 + $0x70] sm:$0xff]  }
 0x24d   : > { %v2328_v7 = vsel %vm6535_vm3, %v2296_v38, %v1991_v22  ;;  %v2425_v14 = vsel %vm6520_vm4, %v2392_v49, %v2118_v28  ;;  %vm6548_vm3 = vmmov %vm6546_vm14 }
 0x24e   : > { %v2361_v43 = vsel %vm6536_vm5, %v2328_v7, %v2039_v25  ;;  %v2458_v9 = vsel %vm6537_vm6, %v2425_v14, %v2166_v30  ;;  %vm6549_vm4 = vmmov %vm6547_vm2  ;;  %v4064_v14 = vld [vmem:[%s4245_s27 + $0x78] sm:$0xff]   ;;  %s6099_s27 = scalar_lea.hbm %s6160_s9, %s3745_s22 }
 0x24f   : > { %v2394_v60 = vsel %vm6538_vm1, %v2361_v43, %v2072_v4  ;;  %v2491_v48 = vsel %vm6539_vm8, %v2458_v9, %v2198_v42  ;;  %vm6550_vm5 = vmmov %vm6547_vm2 }
 0x250   : > { %v2427_v47 = vsel %vm6540_vm15, %v2394_v60, %v2120_v39  ;;  %v2200_v24 = vpop.permute.xlu1 %2199  ;;  %v2245_v26 = vpop.permute.xlu0 %2244  ;;  %vm6551_vm6 = vmmov %vm6547_vm2 }
 0x251   : > { %v2460_v37 = vsel %vm6541_vm12, %v2427_v47, %v2168_v41  ;;  %v2524_v0 = vsel %vm6542_vm13, %v2491_v48, %v2245_v26  ;;  %v3864_v19 = vpop.f32.mrf.mxu0  ;;  %vm6552_vm1 = vmmov %vm6547_vm2 }
 0x252   : > { %3890 = vmatprep.mubr.msk.bf16.mxu1 %vm6543_vm10, %v2524_v0  ;;  %v2493_v59 = vsel %vm6529_vm7, %v2460_v37, %v2200_v24  ;;  %v2650_v3 = vadd.f32 %v3864_v19, %v5871_v18  ;;  %vm6553_vm8 = vmmov %vm6552_vm1 }
 0x253   : > { %v2641_v40 = vpop.f32.mrf.mxu0  ;;  %vm6554_vm15 = vmmov %vm6552_vm1 }
 0x254   : > { %v2247_v16 = vpop.permute.xlu1 %2246  ;;  %v2642_v42 = vadd.f32 %v5871_v18, %v2641_v40  ;;  %v2770_v31 = vmax.f32 %v2650_v3, 0.0  ;;  %vm6555_vm12 = vmmov %vm6552_vm1 }
 0x255   : > { %v2526_v55 = vsel %vm6530_vm9, %v2493_v59, %v2247_v16  ;;  %v3865_v4 = vpop.f32.mrf.mxu0  ;;  %vm6556_vm13 = vmmov %vm6548_vm3 }
 0x256   : > { %v2653_v10 = vadd.f32 %v3865_v4, %v5871_v18  ;;  %3891 = vmatmul.mubr.msk.bf16.gmra.mxu1 %vm6544_vm0, %v2526_v55  ;;  %v2768_v27 = vmax.f32 %v2642_v42, 0.0  ;;  %vm6557_vm10 = vmmov %vm6548_vm3 }
 0x257   : > { %v2644_v53 = vpop.f32.mrf.mxu0  ;;  %3930 = vmatprep.mubr.msk.bf16.mxu1 %vm6545_vm11, %v4049_v15  ;;  %vm6558_vm7 = vmmov %vm6552_vm1 }
 0x258   : > { %v2645_v52 = vadd.f32 %v5871_v18, %v2644_v53  ;;  %v2771_v2 = vmax.f32 %v2653_v10, 0.0  ;;  %vm6559_vm9 = vmmov %vm6552_vm1 }
 0x259   : > { %vm6560_vm0 = vmmov %vm6552_vm1 }
 0x25a   : > { %v2769_v5 = vmax.f32 %v2645_v52, 0.0  ;;  %v2801_v50 = vpack.c.bf16 %v2771_v2, %v2770_v31  ;;  %vm6561_vm11 = vmmov %vm6560_vm0 }
 0x25c   : > { %v2800_v1 = vpack.c.bf16 %v2769_v5, %v2768_v27 }
 0x25e   : > { %3896 = vmatprep.mubr.msk.bf16.mxu0 %vm6546_vm14, %v2800_v1  ;;  %3931 = vmatmul.mubr.msk.bf16.vlgmr.msra.gmra.mxu1 %vm6547_vm2, %v4050_v33  ;;  %vm6562_vm14 = vmmov %vm6560_vm0 }
 0x25f   : > { %3897 = vmatmul.mubr.msk.bf16.vlgmr.msra.gmra.mxu0 %vm6548_vm3, %v2801_v50  ;;  %3934 = vmatprep.mubr.msk.bf16.mxu1 %vm6549_vm4, %v4051_v34  ;;  %vm6563_vm2 = vmmov %vm6560_vm0 }
 0x260   : > { %vm6564_vm3 = vmmov %vm6560_vm0 }
 0x261   : > { %vm6565_vm4 = vmmov %vm6557_vm10 }
 0x266   : > { %3935 = vmatmul.mubr.msk.bf16.gmra.mxu1 %vm6550_vm5, %v4052_v23  ;;  %vm6566_vm5 = vmmov %vm6565_vm4 }
 0x267   : > { %3938 = vmatprep.mubr.msk.bf16.mxu1 %vm6551_vm6, %v4053_v21  ;;  %vm6567_vm6 = vmmov %vm6565_vm4 }
 0x26e   : > { %3939 = vmatmul.mubr.msk.bf16.gmra.mxu1 %vm6552_vm1, %v4054_v12  ;;  %vm6568_vm1 = vmmov %vm6565_vm4 }
 0x26f   : > { %3942 = vmatprep.mubr.msk.bf16.mxu1 %vm6553_vm8, %v4055_v61  ;;  %vm6569_vm8 = vmmov %vm6568_vm1 }
 0x270   : > { %v3868_v57 = vpop.f32.mrf.mxu1 }
 0x271   : > { %v2666_v41 = vadd.f32 %v3868_v57, %v5871_v18 }
 0x272   : > { %v2657_v36 = vpop.f32.mrf.mxu1 }
 0x273   : > { %v2658_v63 = vadd.f32 %v5871_v18, %v2657_v36  ;;  %v2774_v39 = vmax.f32 %v2666_v41, 0.0 }
 0x274   : > { %v3869_v6 = vpop.f32.mrf.mxu1 }
 0x275   : > { %v2669_v56 = vadd.f32 %v3869_v6, %v5871_v18  ;;  %v2772_v25 = vmax.f32 %v2658_v63, 0.0 }
 0x276   : > { %v2660_v8 = vpop.f32.mrf.mxu1  ;;  %3943 = vmatmul.mubr.msk.bf16.gmra.mxu1 %vm6554_vm15, %v4056_v32  ;;  %vm6570_vm15 = vmmov %vm6568_vm1 }
 0x277   : > { %v2661_v35 = vadd.f32 %v5871_v18, %v2660_v8  ;;  %3946 = vmatprep.mubr.msk.bf16.mxu1 %vm6555_vm12, %v4057_v46  ;;  %v2775_v11 = vmax.f32 %v2669_v56, 0.0  ;;  %vm6571_vm12 = vmmov %vm6568_vm1 }
 0x279   : > { %v2773_v30 = vmax.f32 %v2661_v35, 0.0  ;;  %v2803_v45 = vpack.c.bf16 %v2775_v11, %v2774_v39 }
 0x27b   : > { %v2802_v54 = vpack.c.bf16 %v2773_v30, %v2772_v25 }
 0x27d   : > { %3900 = vmatprep.mubr.msk.bf16.mxu0 %vm6556_vm13, %v2802_v54  ;;  %vm6572_vm13 = vmmov %vm6568_vm1 }
 0x27e   : > { %3901 = vmatmul.mubr.msk.bf16.gmra.mxu0 %vm6557_vm10, %v2803_v45  ;;  %3947 = vmatmul.mubr.msk.bf16.gmra.mxu1 %vm6558_vm7, %v4058_v62  ;;  %vm6573_vm10 = vmmov %vm6568_vm1 }
 0x27f   : > { %3950 = vmatprep.mubr.msk.bf16.mxu1 %vm6559_vm9, %v4059_v29  ;;  %vm6574_vm7 = vmmov %vm6568_vm1 }
 0x280   : > { %vm6575_vm9 = vmmov %vm6568_vm1 }
 0x286   : > { %3951 = vmatmul.mubr.msk.bf16.gmra.mxu1 %vm6560_vm0, %v4060_v17  ;;  %vm6576_vm0 = vmmov %vm6568_vm1 }
 0x287   : > { %3954 = vmatprep.mubr.msk.bf16.mxu1 %vm6561_vm11, %v4061_v58  ;;  %vm3436_vm11 = vcmask 257024  }
 0x28e   : > { %3955 = vmatmul.mubr.msk.bf16.gmra.mxu1 %vm6562_vm14, %v4062_v13 }
 0x28f   : > { %3958 = vmatprep.mubr.msk.bf16.mxu1 %vm6563_vm2, %v4063_v51 }
 0x290   : > { %v3872_v44 = vpop.f32.mrf.mxu1 }
 0x291   : > { %v2682_v28 = vadd.f32 %v3872_v44, %v5871_v18 }
 0x292   : > { %v2673_v20 = vpop.f32.mrf.mxu1 }
 0x293   : > { %v2674_v22 = vadd.f32 %v5871_v18, %v2673_v20  ;;  %v2778_v47 = vmax.f32 %v2682_v28, 0.0 }
 0x294   : > { %v3873_v38 = vpop.f32.mrf.mxu1 }
 0x295   : > { %v2685_v49 = vadd.f32 %v3873_v38, %v5871_v18  ;;  %v2776_v60 = vmax.f32 %v2674_v22, 0.0 }
 0x296   : > { %v2676_v7 = vpop.f32.mrf.mxu1  ;;  %3959 = vmatmul.mubr.msk.bf16.gmra.mxu1 %vm6564_vm3, %v4064_v14 }
 0x297   : > { %v2677_v43 = vadd.f32 %v5871_v18, %v2676_v7  ;;  %v2779_v9 = vmax.f32 %v2685_v49, 0.0 }
 0x299   : > { %v2777_v48 = vmax.f32 %v2677_v43, 0.0  ;;  %v2805_v26 = vpack.c.bf16 %v2779_v9, %v2778_v47 }
 0x29b   : > { %v2804_v24 = vpack.c.bf16 %v2777_v48, %v2776_v60 }
 0x29d   : > { %3904 = vmatprep.mubr.msk.bf16.mxu0 %vm6565_vm4, %v2804_v24 }
 0x29e   : > { %3905 = vmatmul.mubr.msk.bf16.gmra.mxu0 %vm6566_vm5, %v2805_v26 }
 0x2b0   : > { %v3876_v37 = vpop.f32.mrf.mxu1 }
 0x2b1   : > { %v2698_v16 = vadd.f32 %v3876_v37, %v5871_v18 }
 0x2b2   : > { %v2689_v0 = vpop.f32.mrf.mxu1 }
 0x2b3   : > { %v2690_v40 = vadd.f32 %v5871_v18, %v2689_v0  ;;  %v2782_v53 = vmax.f32 %v2698_v16, 0.0  ;;  %v5956_v0 = vld [vmem:[%s6157_s6] ss:$0 sm:$0xff] }
 0x2b4   : > { %v3877_v19 = vpop.f32.mrf.mxu1 }
 0x2b5   : > { %v2701_v59 = vadd.f32 %v3877_v19, %v5871_v18  ;;  %v2780_v10 = vmax.f32 %v2690_v40, 0.0 }
 0x2b6   : > { %v2692_v55 = vpop.f32.mrf.mxu1 }
 0x2b7   : > { %v2693_v4 = vadd.f32 %v5871_v18, %v2692_v55  ;;  %v2783_v42 = vmax.f32 %v2701_v59, 0.0 }
 0x2b9   : > { %v2781_v3 = vmax.f32 %v2693_v4, 0.0  ;;  %v2807_v52 = vpack.c.bf16 %v2783_v42, %v2782_v53 }
 0x2bb   : > { %v2806_v15 = vpack.c.bf16 %v2781_v3, %v2780_v10 }
 0x2bd   : > { %3908 = vmatprep.mubr.msk.bf16.mxu0 %vm6567_vm6, %v2806_v15 }
 0x2be   : > { %3909 = vmatmul.mubr.msk.bf16.gmra.mxu0 %vm6568_vm1, %v2807_v52 }
 0x2d0   : > { %v3880_v2 = vpop.f32.mrf.mxu1 }
 0x2d1   : > { %v2714_v50 = vadd.f32 %v3880_v2, %v5871_v18 }
 0x2d2   : > { %v2705_v27 = vpop.f32.mrf.mxu1 }
 0x2d3   : > { %v2706_v31 = vadd.f32 %v5871_v18, %v2705_v27  ;;  %v2786_v61 = vmax.f32 %v2714_v50, 0.0 }
 0x2d4   : > { %v3881_v5 = vpop.f32.mrf.mxu1 }
 0x2d5   : > { %v2717_v1 = vadd.f32 %v3881_v5, %v5871_v18  ;;  %v2784_v21 = vmax.f32 %v2706_v31, 0.0 }
 0x2d6   : > { %v2708_v33 = vpop.f32.mrf.mxu1 }
 0x2d7   : > { %v2709_v34 = vadd.f32 %v5871_v18, %v2708_v33  ;;  %v2787_v23 = vmax.f32 %v2717_v1, 0.0 }
 0x2d9   : > { %v2785_v12 = vmax.f32 %v2709_v34, 0.0  ;;  %v2809_v36 = vpack.c.bf16 %v2787_v23, %v2786_v61 }
 0x2db   : > { %v2808_v57 = vpack.c.bf16 %v2785_v12, %v2784_v21 }
 0x2dd   : > { %3912 = vmatprep.mubr.msk.bf16.mxu0 %vm6569_vm8, %v2808_v57 }
 0x2de   : > { %3913 = vmatmul.mubr.msk.bf16.gmra.mxu0 %vm6570_vm15, %v2809_v36 }
 0x2ec   : > { %v3884_v6 = vpop.f32.mrf.mxu1 }
 0x2ed   : > { %v2730_v32 = vadd.f32 %v3884_v6, %v5871_v18 }
 0x2ee   : > { %v2721_v63 = vpop.f32.mrf.mxu1 }
 0x2ef   : > { %v2722_v41 = vadd.f32 %v5871_v18, %v2721_v63  ;;  %v2790_v39 = vmax.f32 %v2730_v32, 0.0 }
 0x2f0   : > { %v3885_v56 = vpop.f32.mrf.mxu1 }
 0x2f1   : > { %v2733_v8 = vadd.f32 %v3885_v56, %v5871_v18  ;;  %v2788_v25 = vmax.f32 %v2722_v41, 0.0 }
 0x2f2   : > { %v2724_v35 = vpop.f32.mrf.mxu1 }
 0x2f3   : > { %v2725_v46 = vadd.f32 %v5871_v18, %v2724_v35  ;;  %v2791_v11 = vmax.f32 %v2733_v8, 0.0 }
 0x2f5   : > { %v2789_v30 = vmax.f32 %v2725_v46, 0.0  ;;  %v2811_v45 = vpack.c.bf16 %v2791_v11, %v2790_v39 }
 0x2f7   : > { %v2810_v54 = vpack.c.bf16 %v2789_v30, %v2788_v25 }
 0x2f9   : > { %3916 = vmatprep.mubr.msk.bf16.mxu0 %vm6571_vm12, %v2810_v54 }
 0x2fa   : > { %3917 = vmatmul.mubr.msk.bf16.gmra.mxu0 %vm6572_vm13, %v2811_v45 }
 0x30c   : > { %v3888_v62 = vpop.f32.mrf.mxu1 }
 0x30d   : > { %v2746_v51 = vadd.f32 %v3888_v62, %v5871_v18 }
 0x30e   : > { %v2737_v29 = vpop.f32.mrf.mxu1 }
 0x30f   : > { %v2738_v58 = vadd.f32 %v5871_v18, %v2737_v29  ;;  %v2794_v28 = vmax.f32 %v2746_v51, 0.0 }
 0x310   : > { %v3889_v17 = vpop.f32.mrf.mxu1 }
 0x311   : > { %v2749_v13 = vadd.f32 %v3889_v17, %v5871_v18  ;;  %v2792_v22 = vmax.f32 %v2738_v58, 0.0 }
 0x312   : > { %v2740_v44 = vpop.f32.mrf.mxu1 }
 0x313   : > { %v2741_v20 = vadd.f32 %v5871_v18, %v2740_v44  ;;  %v2795_v38 = vmax.f32 %v2749_v13, 0.0 }
 0x315   : > { %v2793_v49 = vmax.f32 %v2741_v20, 0.0  ;;  %v2813_v43 = vpack.c.bf16 %v2795_v38, %v2794_v28 }
 0x316   : > { %v3892_v7 = vpop.f32.mrf.mxu1 }
 0x317   : > { %v2812_v14 = vpack.c.bf16 %v2793_v49, %v2792_v22  ;;  %v2762_v24 = vadd.f32 %v3892_v7, %v5871_v18 }
 0x318   : > { %v2753_v9 = vpop.f32.mrf.mxu1 }
 0x319   : > { %3920 = vmatprep.mubr.msk.bf16.mxu0 %vm6573_vm10, %v2812_v14  ;;  %v2754_v48 = vadd.f32 %v5871_v18, %v2753_v9  ;;  %v2798_v4 = vmax.f32 %v2762_v24, 0.0 }
 0x31a   : > { %v3893_v60 = vpop.f32.mrf.mxu1  ;;  %3921 = vmatmul.mubr.msk.bf16.gmra.mxu0 %vm6574_vm7, %v2813_v43 }
 0x31b   : > { %v2765_v47 = vadd.f32 %v3893_v60, %v5871_v18  ;;  %v2796_v59 = vmax.f32 %v2754_v48, 0.0 }
 0x31c   : > { %v2756_v26 = vpop.f32.mrf.mxu1 }
 0x31d   : > { %v2757_v37 = vadd.f32 %v5871_v18, %v2756_v26  ;;  %v2799_v19 = vmax.f32 %v2765_v47, 0.0  ;;  %v5963_v18 = vld [vmem:[%s6159_s8] ss:$0 sm:$0xff] }
 0x31e   : > { %v3932_v40 = vpop.f32.mrf.mxu1 }
 0x31f   : > { %v2797_v16 = vmax.f32 %v2757_v37, 0.0  ;;  %v3898_v55 = vpop.f32.mrf.mxu0  ;;  %v2815_v15 = vpack.c.bf16 %v2799_v19, %v2798_v4 }
 0x320   : > { %v2918_v42 = vadd.f32 %v3898_v55, %v5956_v0  ;;  %v3078_v10 = vpop.f32.mrf.mxu1 }
 0x321   : > { %v2814_v3 = vpack.c.bf16 %v2797_v16, %v2796_v59  ;;  %v2909_v53 = vpop.f32.mrf.mxu0 }
 0x322   : > { %v2910_v52 = vadd.f32 %v5956_v0, %v2909_v53  ;;  %v3207_v2 = vadd.f32 %v3932_v40, %v2918_v42  ;;  %v3933_v27 = vpop.f32.mrf.mxu1 }
 0x323   : > { %v3899_v5 = vpop.f32.mrf.mxu0  ;;  %3924 = vmatprep.mubr.msk.bf16.mxu0 %vm6575_vm9, %v2814_v3 }
 0x324   : > { %v3246_v31 = vadd.f32 %v5963_v18, %v3207_v2  ;;  %v2921_v1 = vadd.f32 %v3899_v5, %v5956_v0  ;;  %v3205_v50 = vadd.f32 %v3078_v10, %v2910_v52  ;;  %3925 = vmatmul.mubr.msk.bf16.gmra.mxu0 %vm6576_vm0, %v2815_v15  ;;  %v3081_v34 = vpop.f32.mrf.mxu1 }
 0x325   : > { %v2912_v33 = vpop.f32.mrf.mxu0 }
 0x326   : > { %v3278_v23 = vmax.f32 %v3246_v31, 0.0  ;;  %v3244_v21 = vadd.f32 %v5963_v18, %v3205_v50  ;;  %v2913_v12 = vadd.f32 %v5956_v0, %v2912_v33  ;;  %v3208_v61 = vadd.f32 %v3933_v27, %v2921_v1  ;;  %v3936_v11 = vpop.f32.mrf.mxu1 }
 0x328   : > { %v3715_v57 = vpack.c.bf16 %v3278_v23, %v3278_v23  ;;  %v3276_v36 = vmax.f32 %v3244_v21, 0.0  ;;  %v3247_v6 = vadd.f32 %v5963_v18, %v3208_v61  ;;  %v3206_v63 = vadd.f32 %v3081_v34, %v2913_v12  ;;  %v3094_v25 = vpop.f32.mrf.mxu1 }
 0x32a   : > { %3439 = vst.msk [vmem:[%s5975_s17 + $0x8] sm:$0xf] %vm3436_vm11, %v3715_v57  ;;  %v3713_v56 = vpack.c.bf16 %v3276_v36, %v3276_v36  ;;  %v3279_v41 = vmax.f32 %v3247_v6, 0.0  ;;  %v3245_v8 = vadd.f32 %v5963_v18, %v3206_v63  ;;  %v3937_v45 = vpop.f32.mrf.mxu1 }
 0x32c   : > { %3437 = vst.msk [vmem:[%s5975_s17] sm:$0xf] %vm3436_vm11, %v3713_v56  ;;  %v3716_v32 = vpack.c.bf16 %v3279_v41, %v3279_v41  ;;  %v3277_v35 = vmax.f32 %v3245_v8, 0.0  ;;  %v3097_v20 = vpop.f32.mrf.mxu1 }
 0x32e   : > { %3440 = vst.msk [vmem:[%s5975_s17 + $0xc] sm:$0xf] %vm3436_vm11, %v3716_v32  ;;  %v3714_v46 = vpack.c.bf16 %v3277_v35, %v3277_v35  ;;  %v3940_v19 = vpop.f32.mrf.mxu1 }
 0x330   : > { %3438 = vst.msk [vmem:[%s5975_s17 + $0x4] sm:$0xf] %vm3436_vm11, %v3714_v46  ;;  %v3110_v40 = vpop.f32.mrf.mxu1 }
 0x332   : > { %v3941_v4 = vpop.f32.mrf.mxu1 }
 0x334   : > { %v3113_v27 = vpop.f32.mrf.mxu1 }
 0x336   : > { %v3944_v56 = vpop.f32.mrf.mxu1 }
 0x338   : > { %v3126_v41 = vpop.f32.mrf.mxu1 }
 0x33a   : > { %v3945_v46 = vpop.f32.mrf.mxu1 }
 0x33e   : > { %v3902_v30 = vpop.f32.mrf.mxu0 }
 0x33f   : > { %v2934_v39 = vadd.f32 %v3902_v30, %v5956_v0 }
 0x340   : > { %v2925_v54 = vpop.f32.mrf.mxu0 }
 0x341   : > { %v2926_v62 = vadd.f32 %v5956_v0, %v2925_v54  ;;  %v3211_v29 = vadd.f32 %v3936_v11, %v2934_v39 }
 0x342   : > { %v3903_v17 = vpop.f32.mrf.mxu0 }
 0x343   : > { %v3250_v58 = vadd.f32 %v5963_v18, %v3211_v29  ;;  %v2937_v13 = vadd.f32 %v3903_v17, %v5956_v0  ;;  %v3209_v51 = vadd.f32 %v3094_v25, %v2926_v62  ;;  %v3129_v29 = vpop.f32.mrf.mxu1 }
 0x344   : > { %v2928_v44 = vpop.f32.mrf.mxu0 }
 0x345   : > { %v3282_v38 = vmax.f32 %v3250_v58, 0.0  ;;  %v3248_v22 = vadd.f32 %v5963_v18, %v3209_v51  ;;  %v2929_v49 = vadd.f32 %v5956_v0, %v2928_v44  ;;  %v3212_v28 = vadd.f32 %v3937_v45, %v2937_v13 }
 0x347   : > { %v3719_v7 = vpack.c.bf16 %v3282_v38, %v3282_v38  ;;  %v3280_v14 = vmax.f32 %v3248_v22, 0.0  ;;  %v3251_v43 = vadd.f32 %v5963_v18, %v3212_v28  ;;  %v3210_v9 = vadd.f32 %v3097_v20, %v2929_v49 }
 0x349   : > { %3443 = vst.msk [vmem:[%s5975_s17 + $0x18] sm:$0xf] %vm3436_vm11, %v3719_v7  ;;  %v3717_v60 = vpack.c.bf16 %v3280_v14, %v3280_v14  ;;  %v3283_v48 = vmax.f32 %v3251_v43, 0.0  ;;  %v3249_v47 = vadd.f32 %v5963_v18, %v3210_v9 }
 0x34b   : > { %3441 = vst.msk [vmem:[%s5975_s17 + $0x10] sm:$0xf] %vm3436_vm11, %v3717_v60  ;;  %v3720_v24 = vpack.c.bf16 %v3283_v48, %v3283_v48  ;;  %v3281_v26 = vmax.f32 %v3249_v47, 0.0  ;;  %v3948_v60 = vpop.f32.mrf.mxu1 }
 0x34d   : > { %3444 = vst.msk [vmem:[%s5975_s17 + $0x1c] sm:$0xf] %vm3436_vm11, %v3720_v24  ;;  %v3718_v37 = vpack.c.bf16 %v3281_v26, %v3281_v26  ;;  %v3142_v48 = vpop.f32.mrf.mxu1 }
 0x34f   : > { %3442 = vst.msk [vmem:[%s5975_s17 + $0x14] sm:$0xf] %vm3436_vm11, %v3718_v37  ;;  %v3949_v37 = vpop.f32.mrf.mxu1 }
 0x35e   : > { %v3906_v59 = vpop.f32.mrf.mxu0 }
 0x35f   : > { %v2950_v16 = vadd.f32 %v3906_v59, %v5956_v0 }
 0x360   : > { %v2941_v55 = vpop.f32.mrf.mxu0 }
 0x361   : > { %v2942_v42 = vadd.f32 %v5956_v0, %v2941_v55  ;;  %v3215_v10 = vadd.f32 %v3940_v19, %v2950_v16 }
 0x362   : > { %v3907_v3 = vpop.f32.mrf.mxu0 }
 0x363   : > { %v3254_v53 = vadd.f32 %v5963_v18, %v3215_v10  ;;  %v2953_v15 = vadd.f32 %v3907_v3, %v5956_v0  ;;  %v3213_v52 = vadd.f32 %v3110_v40, %v2942_v42  ;;  %v3145_v10 = vpop.f32.mrf.mxu1 }
 0x364   : > { %v2944_v2 = vpop.f32.mrf.mxu0 }
 0x365   : > { %v3286_v5 = vmax.f32 %v3254_v53, 0.0  ;;  %v3252_v31 = vadd.f32 %v5963_v18, %v3213_v52  ;;  %v2945_v1 = vadd.f32 %v5956_v0, %v2944_v2  ;;  %v3216_v50 = vadd.f32 %v3941_v4, %v2953_v15 }
 0x367   : > { %v3723_v33 = vpack.c.bf16 %v3286_v5, %v3286_v5  ;;  %v3284_v34 = vmax.f32 %v3252_v31, 0.0  ;;  %v3255_v23 = vadd.f32 %v5963_v18, %v3216_v50  ;;  %v3214_v21 = vadd.f32 %v3113_v27, %v2945_v1 }
 0x369   : > { %3447 = vst.msk [vmem:[%s5975_s17 + $0x28] sm:$0xf] %vm3436_vm11, %v3723_v33  ;;  %v3721_v12 = vpack.c.bf16 %v3284_v34, %v3284_v34  ;;  %v3287_v61 = vmax.f32 %v3255_v23, 0.0  ;;  %v3253_v57 = vadd.f32 %v5963_v18, %v3214_v21 }
 0x36b   : > { %3445 = vst.msk [vmem:[%s5975_s17 + $0x20] sm:$0xf] %vm3436_vm11, %v3721_v12  ;;  %v3724_v36 = vpack.c.bf16 %v3287_v61, %v3287_v61  ;;  %v3285_v6 = vmax.f32 %v3253_v57, 0.0  ;;  %v3952_v12 = vpop.f32.mrf.mxu1 }
 0x36d   : > { %3448 = vst.msk [vmem:[%s5975_s17 + $0x2c] sm:$0xf] %vm3436_vm11, %v3724_v36  ;;  %v3722_v63 = vpack.c.bf16 %v3285_v6, %v3285_v6  ;;  %v3158_v61 = vpop.f32.mrf.mxu1 }
 0x36f   : > { %3446 = vst.msk [vmem:[%s5975_s17 + $0x24] sm:$0xf] %vm3436_vm11, %v3722_v63  ;;  %v3953_v63 = vpop.f32.mrf.mxu1 }
 0x37e   : > { %v3910_v8 = vpop.f32.mrf.mxu0 }
 0x37f   : > { %v2966_v32 = vadd.f32 %v3910_v8, %v5956_v0 }
 0x380   : > { %v2957_v35 = vpop.f32.mrf.mxu0 }
 0x381   : > { %v2958_v11 = vadd.f32 %v5956_v0, %v2957_v35  ;;  %v3219_v25 = vadd.f32 %v3944_v56, %v2966_v32 }
 0x382   : > { %v3911_v30 = vpop.f32.mrf.mxu0 }
 0x383   : > { %v3258_v39 = vadd.f32 %v5963_v18, %v3219_v25  ;;  %v2969_v54 = vadd.f32 %v3911_v30, %v5956_v0  ;;  %v3217_v45 = vadd.f32 %v3126_v41, %v2958_v11  ;;  %v3161_v25 = vpop.f32.mrf.mxu1 }
 0x384   : > { %v2960_v62 = vpop.f32.mrf.mxu0 }
 0x385   : > { %v3290_v17 = vmax.f32 %v3258_v39, 0.0  ;;  %v3256_v58 = vadd.f32 %v5963_v18, %v3217_v45  ;;  %v2961_v13 = vadd.f32 %v5956_v0, %v2960_v62  ;;  %v3220_v51 = vadd.f32 %v3945_v46, %v2969_v54 }
 0x387   : > { %v3727_v44 = vpack.c.bf16 %v3290_v17, %v3290_v17  ;;  %v3288_v20 = vmax.f32 %v3256_v58, 0.0  ;;  %v3259_v38 = vadd.f32 %v5963_v18, %v3220_v51  ;;  %v3218_v22 = vadd.f32 %v3129_v29, %v2961_v13 }
 0x389   : > { %3451 = vst.msk [vmem:[%s5975_s17 + $0x38] sm:$0xf] %vm3436_vm11, %v3727_v44  ;;  %v3725_v49 = vpack.c.bf16 %v3288_v20, %v3288_v20  ;;  %v3291_v28 = vmax.f32 %v3259_v38, 0.0  ;;  %v3257_v7 = vadd.f32 %v5963_v18, %v3218_v22 }
 0x38b   : > { %3449 = vst.msk [vmem:[%s5975_s17 + $0x30] sm:$0xf] %vm3436_vm11, %v3725_v49  ;;  %v3728_v14 = vpack.c.bf16 %v3291_v28, %v3291_v28  ;;  %v3289_v43 = vmax.f32 %v3257_v7, 0.0  ;;  %v3956_v49 = vpop.f32.mrf.mxu1 }
 0x38d   : > { %3452 = vst.msk [vmem:[%s5975_s17 + $0x3c] sm:$0xf] %vm3436_vm11, %v3728_v14  ;;  %v3726_v9 = vpack.c.bf16 %v3289_v43, %v3289_v43  ;;  %v3174_v28 = vpop.f32.mrf.mxu1 }
 0x38f   : > { %3450 = vst.msk [vmem:[%s5975_s17 + $0x34] sm:$0xf] %vm3436_vm11, %v3726_v9  ;;  %v3957_v7 = vpop.f32.mrf.mxu1 }
 0x39e   : > { %v3914_v47 = vpop.f32.mrf.mxu0 }
 0x39f   : > { %v2982_v24 = vadd.f32 %v3914_v47, %v5956_v0 }
 0x3a0   : > { %v2973_v26 = vpop.f32.mrf.mxu0 }
 0x3a1   : > { %v2974_v19 = vadd.f32 %v5956_v0, %v2973_v26  ;;  %v3223_v40 = vadd.f32 %v3948_v60, %v2982_v24  ;;  %v3177_v60 = vpop.f32.mrf.mxu1 }
 0x3a2   : > { %v3915_v59 = vpop.f32.mrf.mxu0 }
 0x3a3   : > { %v3262_v16 = vadd.f32 %v5963_v18, %v3223_v40  ;;  %v2985_v55 = vadd.f32 %v3915_v59, %v5956_v0  ;;  %v3221_v4 = vadd.f32 %v3142_v48, %v2974_v19  ;;  %v3960_v59 = vpop.f32.mrf.mxu1 }
 0x3a4   : > { %v2976_v42 = vpop.f32.mrf.mxu0 }
 0x3a5   : > { %v3294_v3 = vmax.f32 %v3262_v16, 0.0  ;;  %v3260_v53 = vadd.f32 %v5963_v18, %v3221_v4  ;;  %v2977_v15 = vadd.f32 %v5956_v0, %v2976_v42  ;;  %v3224_v52 = vadd.f32 %v3949_v37, %v2985_v55 }
 0x3a7   : > { %v3731_v2 = vpack.c.bf16 %v3294_v3, %v3294_v3  ;;  %v3292_v27 = vmax.f32 %v3260_v53, 0.0  ;;  %v3263_v5 = vadd.f32 %v5963_v18, %v3224_v52  ;;  %v3222_v31 = vadd.f32 %v3145_v10, %v2977_v15  ;;  %v3190_v52 = vpop.f32.mrf.mxu1 }
 0x3a9   : > { %3455 = vst.msk [vmem:[%s5975_s17 + $0x48] sm:$0xf] %vm3436_vm11, %v3731_v2  ;;  %v3729_v1 = vpack.c.bf16 %v3292_v27, %v3292_v27  ;;  %v3295_v50 = vmax.f32 %v3263_v5, 0.0  ;;  %v3261_v33 = vadd.f32 %v5963_v18, %v3222_v31 }
 0x3ab   : > { %3453 = vst.msk [vmem:[%s5975_s17 + $0x40] sm:$0xf] %vm3436_vm11, %v3729_v1  ;;  %v3732_v34 = vpack.c.bf16 %v3295_v50, %v3295_v50  ;;  %v3293_v23 = vmax.f32 %v3261_v33, 0.0 }
 0x3ad   : > { %3456 = vst.msk [vmem:[%s5975_s17 + $0x4c] sm:$0xf] %vm3436_vm11, %v3732_v34  ;;  %v3730_v21 = vpack.c.bf16 %v3293_v23, %v3293_v23 }
 0x3af   : > { %3454 = vst.msk [vmem:[%s5975_s17 + $0x44] sm:$0xf] %vm3436_vm11, %v3730_v21 }
 0x3ba   : > { %v3918_v57 = vpop.f32.mrf.mxu0 }
 0x3bb   : > { %v2998_v36 = vadd.f32 %v3918_v57, %v5956_v0 }
 0x3bc   : > { %v2989_v6 = vpop.f32.mrf.mxu0 }
 0x3bd   : > { %v2990_v56 = vadd.f32 %v5956_v0, %v2989_v6  ;;  %v3227_v41 = vadd.f32 %v3952_v12, %v2998_v36  ;;  %v3961_v12 = vpop.f32.mrf.mxu1 }
 0x3be   : > { %v3919_v8 = vpop.f32.mrf.mxu0 }
 0x3bf   : > { %v3266_v32 = vadd.f32 %v5963_v18, %v3227_v41  ;;  %v3001_v35 = vadd.f32 %v3919_v8, %v5956_v0  ;;  %v3225_v46 = vadd.f32 %v3158_v61, %v2990_v56 }
 0x3c0   : > { %v2992_v11 = vpop.f32.mrf.mxu0 }
 0x3c1   : > { %v3298_v30 = vmax.f32 %v3266_v32, 0.0  ;;  %v3264_v39 = vadd.f32 %v5963_v18, %v3225_v46  ;;  %v2993_v54 = vadd.f32 %v5956_v0, %v2992_v11  ;;  %v3228_v45 = vadd.f32 %v3953_v63, %v3001_v35  ;;  %v3193_v46 = vpop.f32.mrf.mxu1 }
 0x3c3   : > { %v3735_v62 = vpack.c.bf16 %v3298_v30, %v3298_v30  ;;  %v3296_v29 = vmax.f32 %v3264_v39, 0.0  ;;  %v3267_v17 = vadd.f32 %v5963_v18, %v3228_v45  ;;  %v3226_v58 = vadd.f32 %v3161_v25, %v2993_v54 }
 0x3c5   : > { %3459 = vst.msk [vmem:[%s5975_s17 + $0x58] sm:$0xf] %vm3436_vm11, %v3735_v62  ;;  %v3733_v13 = vpack.c.bf16 %v3296_v29, %v3296_v29  ;;  %v3299_v51 = vmax.f32 %v3267_v17, 0.0  ;;  %v3265_v44 = vadd.f32 %v5963_v18, %v3226_v58 }
 0x3c7   : > { %3457 = vst.msk [vmem:[%s5975_s17 + $0x50] sm:$0xf] %vm3436_vm11, %v3733_v13  ;;  %v3736_v20 = vpack.c.bf16 %v3299_v51, %v3299_v51  ;;  %v3297_v38 = vmax.f32 %v3265_v44, 0.0 }
 0x3c9   : > { %3460 = vst.msk [vmem:[%s5975_s17 + $0x5c] sm:$0xf] %vm3436_vm11, %v3736_v20  ;;  %v3734_v22 = vpack.c.bf16 %v3297_v38, %v3297_v38 }
 0x3cb   : > { %3458 = vst.msk [vmem:[%s5975_s17 + $0x54] sm:$0xf] %vm3436_vm11, %v3734_v22 }
 0x3da   : > { %v3922_v14 = vpop.f32.mrf.mxu0 }
 0x3db   : > { %v3014_v43 = vadd.f32 %v3922_v14, %v5956_v0 }
 0x3dc   : > { %v3005_v9 = vpop.f32.mrf.mxu0 }
 0x3dd   : > { %v3231_v48 = vadd.f32 %v3956_v49, %v3014_v43  ;;  %v3006_v47 = vadd.f32 %v5956_v0, %v3005_v9 }
 0x3de   : > { %v3923_v24 = vpop.f32.mrf.mxu0 }
 0x3df   : > { %v3270_v26 = vadd.f32 %v5963_v18, %v3231_v48  ;;  %v3229_v37 = vadd.f32 %v3174_v28, %v3006_v47  ;;  %v3017_v19 = vadd.f32 %v3923_v24, %v5956_v0 }
 0x3e0   : > { %v3008_v40 = vpop.f32.mrf.mxu0 }
 0x3e1   : > { %v3302_v16 = vmax.f32 %v3270_v26, 0.0  ;;  %v3268_v55 = vadd.f32 %v5963_v18, %v3229_v37  ;;  %v3232_v4 = vadd.f32 %v3957_v7, %v3017_v19  ;;  %v3009_v42 = vadd.f32 %v5956_v0, %v3008_v40 }
 0x3e3   : > { %v3739_v10 = vpack.c.bf16 %v3302_v16, %v3302_v16  ;;  %v3300_v3 = vmax.f32 %v3268_v55, 0.0  ;;  %v3271_v53 = vadd.f32 %v5963_v18, %v3232_v4  ;;  %v3230_v15 = vadd.f32 %v3177_v60, %v3009_v42 }
 0x3e4   : > { %v3926_v2 = vpop.f32.mrf.mxu0 }
 0x3e5   : > { %3463 = vst.msk [vmem:[%s5975_s17 + $0x68] sm:$0xf] %vm3436_vm11, %v3739_v10  ;;  %v3737_v27 = vpack.c.bf16 %v3300_v3, %v3300_v3  ;;  %v3303_v5 = vmax.f32 %v3271_v53, 0.0  ;;  %v3269_v31 = vadd.f32 %v5963_v18, %v3230_v15  ;;  %v3030_v1 = vadd.f32 %v3926_v2, %v5956_v0 }
 0x3e6   : > { %v3021_v50 = vpop.f32.mrf.mxu0 }
 0x3e7   : > { %3461 = vst.msk [vmem:[%s5975_s17 + $0x60] sm:$0xf] %vm3436_vm11, %v3737_v27  ;;  %v3740_v33 = vpack.c.bf16 %v3303_v5, %v3303_v5  ;;  %v3301_v34 = vmax.f32 %v3269_v31, 0.0  ;;  %v3235_v23 = vadd.f32 %v3960_v59, %v3030_v1  ;;  %v3022_v21 = vadd.f32 %v5956_v0, %v3021_v50 }
 0x3e8   : > { %v3927_v61 = vpop.f32.mrf.mxu0 }
 0x3e9   : > { %3464 = vst.msk [vmem:[%s5975_s17 + $0x6c] sm:$0xf] %vm3436_vm11, %v3740_v33  ;;  %v3738_v57 = vpack.c.bf16 %v3301_v34, %v3301_v34  ;;  %v3274_v36 = vadd.f32 %v5963_v18, %v3235_v23  ;;  %v3233_v6 = vadd.f32 %v3190_v52, %v3022_v21  ;;  %v3033_v63 = vadd.f32 %v3927_v61, %v5956_v0 }
 0x3ea   : > { %v3024_v56 = vpop.f32.mrf.mxu0 }
 0x3eb   : > { %3462 = vst.msk [vmem:[%s5975_s17 + $0x64] sm:$0xf] %vm3436_vm11, %v3738_v57  ;;  %v3306_v41 = vmax.f32 %v3274_v36, 0.0  ;;  %v3272_v8 = vadd.f32 %v5963_v18, %v3233_v6  ;;  %v3236_v32 = vadd.f32 %v3961_v12, %v3033_v63  ;;  %v3025_v35 = vadd.f32 %v5956_v0, %v3024_v56 }
 0x3ed   : > { %v3743_v11 = vpack.c.bf16 %v3306_v41, %v3306_v41  ;;  %v3304_v25 = vmax.f32 %v3272_v8, 0.0  ;;  %v3275_v30 = vadd.f32 %v5963_v18, %v3236_v32  ;;  %v3234_v39 = vadd.f32 %v3193_v46, %v3025_v35 }
 0x3ef   : > { %3467 = vst.msk [vmem:[%s5975_s17 + $0x78] sm:$0xf] %vm3436_vm11, %v3743_v11  ;;  %v3741_v54 = vpack.c.bf16 %v3304_v25, %v3304_v25  ;;  %v3307_v45 = vmax.f32 %v3275_v30, 0.0  ;;  %v3273_v62 = vadd.f32 %v5963_v18, %v3234_v39 }
 0x3f1   : > { %3465 = vst.msk [vmem:[%s5975_s17 + $0x70] sm:$0xf] %vm3436_vm11, %v3741_v54  ;;  %v3744_v0 = vpack.c.bf16 %v3307_v45, %v3307_v45  ;;  %v3305_v29 = vmax.f32 %v3273_v62, 0.0 }
 0x3f3   : > { %3468 = vst.msk [vmem:[%s5975_s17 + $0x7c] sm:$0xf] %vm3436_vm11, %v3744_v0  ;;  %v3742_v17 = vpack.c.bf16 %v3305_v29, %v3305_v29 }
 0x3f5   : > { %3466 = vst.msk [vmem:[%s5975_s17 + $0x74] sm:$0xf] %vm3436_vm11, %v3742_v17 }
 0x3f6   : > { %4078 = shalt.err (!%p4075_p3)
}
 0x3f7   : > { %s4079_s26 = scalar_lea.hbm %s6099_s27, 2048  ;;  %s4083_s16 = scalar_lea.hbm %s6160_s9, 4096 }
 0x3f8   : > { %p4080_p4 = scmp.ne.s32.totalorder %s6099_s27, %s4079_s26  ;;  %p4084_p9 = scmp.lt.s32.totalorder %s6099_s27, %s6160_s9 }
 0x3f9   : > { %p4085_p10 = scmp.lt.s32.totalorder %s4083_s16, %s4079_s26 }
 0x3fa   : > { %p4081_p7 = pnand %p4080_p4, %p4227_p5 }
 0x3fb   : > { %p4086_p11 = por %p4085_p10, %p4084_p9 }
 0x3fc   : > { %p4082_p8 = pneg %p4081_p7 }
 0x3fe   : > { %p4087_p12 = pnand %p4086_p11, %p4082_p8 }
 0x400   : > { %4090 = shalt.err (!%p4087_p12)
}
 0x401   : > { %s4138_s24 = smov 4  }
 0x402   : > { %3975 = dma.vmem_to_hbm [thread:$0]  (%p4227_p5), %s6103_s23, 2048, %s6099_s27, %s6109_s13, %s4136_s25, %s4136_s25, %s4138_s24  }
 0x403 PF: > { %p3981_p13 = scmp.ge.s32.totalorder %s4125_s12, 2  ;;  %s3498_s14 = sand.u32 1, %s4113_s30  }
 0x404   : > { %s3499_s28 = scalar_lea.sflag [#allocation3], %s3498_s14 }
 0x405   : > { %p3978_p0 = pnand %p3981_p13, %p4231_p6 }
 0x407   : > { %p3979_p1 = pneg %p3978_p0 }
 0x409   : > { %4108 = dma.done.wait (%p3979_p1), %s3499_s28, 2048  }
 0x40a   : > { %4110 = vsyncadd (%p3979_p1), %s3499_s28, 4294965248  ;;  %p19_p2 = scmp.ge.s32.totalorder %s4214_s15, 4   ;;  %s6577_s30 = smov %s4117_s10 }
 0x40b   : > { %s6578_s10 = smov %s4121_s11  ;;  %s6579_s11 = smov %s4225_s18 }
 0x40c   : > { %s6580_s12 = smov %s4214_s15  ;;  %21 = sbr.rel (!%p19_p2) target bundleno = 3 (0x3), region = 91 }
 0x411   :  { %3504 = vsyncpa [#allocation3], 1 }
 0x412   :  { %3506 = vsyncpa [#allocation3 + $0x1], 1 }

</bundles_post_ra>
